<compile_context>
chip_gen: v5e
topology: v5e:2x2
jax: 0.10.0
libtpu: 0.0.40
codegen_flags: <defaults>
</compile_context>

<pallas_src>
import functools
import math

import jax
import jax.numpy as jnp
from jax.experimental import pallas as pl
from jax.experimental.pallas import tpu as pltpu


def _head_group_size(n_head: int, head_dim: int) -> int:
    """Heads per group so one group's q/k/v slice is ~128 lanes (vreg-aligned)."""
    hpg = max(1, min(n_head, 128 // max(1, head_dim)))
    while n_head % hpg:
        hpg -= 1
    return hpg


def _derive_vmem_limit_bytes(T: int, C: int, TQ: int, n_head: int) -> int:
    """Scoped-VMEM request derived from the working set (floor 16 MiB for v5e's
    small default, cap 48 MiB so it also fits v7x's 64 MiB physical VMEM)."""
    bf16, f32 = 2, 4
    weights = 2 * bf16 * (C * 3 * C + C * C)        # double-buffered bf16 weights
    biases = 2 * f32 * (3 * C + C)
    x_blk = 2 * f32 * T * C                         # double-buffered input block
    o_blk = 2 * f32 * TQ * C                        # double-buffered output block
    qkv_scratch = bf16 * T * 3 * C                  # resident bf16 qkv scratch
    D = C // n_head
    work = f32 * (2 * TQ * TQ + TQ * (C + 4 * D))   # score tile + softmax state
    total = weights + biases + x_blk + o_blk + qkv_scratch + work
    return int(min(max(2 * total, 16 << 20), 48 << 20))


# --------------------------------------------------------------------------
# Fused kernel: grid step = (batch element, query tile).
# --------------------------------------------------------------------------
def _fused_attention_kernel(x_ref, wqkv_ref, bqkv_ref, wproj_ref, bproj_ref,
                            o_ref, qkv_ref, *,
                            n_head, heads_per_group, q_tile, kv_tile,
                            masked_bias):
    T, C = x_ref.shape
    D = C // n_head
    TQ, TK = q_tile, kv_tile
    GW = heads_per_group * D
    q_idx = pl.program_id(1)

    # ---- c_attn for the whole sequence of this batch element ----------------
    # bf16 MXU operands, f32 accumulate.  Runs only on the first q-tile step;
    # the bf16 qkv stays resident in VMEM scratch for the remaining q tiles of
    # the same batch element (q axis is "arbitrary" -> sequential per core).
    @pl.when(q_idx == 0)
    def _():
        qkv = jnp.dot(x_ref[...].astype(jnp.bfloat16), wqkv_ref[...],
                      preferred_element_type=jnp.float32)
        qkv = qkv + bqkv_ref[...].astype(jnp.float32)
        qkv_ref[...] = qkv.astype(jnp.bfloat16)

    q0 = pl.multiple_of(q_idx * TQ, TQ)
    neg = jnp.float32(masked_bias)

    out_acc = jnp.zeros((TQ, C), jnp.float32)
    n_groups = n_head // heads_per_group

    for g in range(n_groups):                       # static unroll over head groups
        c0 = g * GW
        # this q tile's query heads for the group (1/sqrt(D) already folded in)
        q_grp = qkv_ref[pl.ds(q0, TQ), c0:c0 + GW]               # (TQ, GW) bf16

        def kv_step(kidx, carry, *, c0=c0, q_grp=q_grp):
            k0 = pl.multiple_of(kidx * TK, TK)
            k_grp = qkv_ref[pl.ds(k0, TK), C + c0:C + c0 + GW]       # (TK, GW)
            v_grp = qkv_ref[pl.ds(k0, TK), 2 * C + c0:2 * C + c0 + GW]
            rows = q0 + jax.lax.broadcasted_iota(jnp.int32, (TQ, TK), 0)
            cols = k0 + jax.lax.broadcasted_iota(jnp.int32, (TQ, TK), 1)
            causal = cols <= rows
            new_carry = []
            for hh in range(heads_per_group):
                m_p, l_p, a_p = carry[hh]
                qh = q_grp[:, hh * D:(hh + 1) * D]
                kh = k_grp[:, hh * D:(hh + 1) * D]
                vh = v_grp[:, hh * D:(hh + 1) * D]
                # scores: contract over D, no k transpose materialized
                s = jax.lax.dot_general(qh, kh, (((1,), (1,)), ((), ())),
                                        preferred_element_type=jnp.float32)
                s = jnp.where(causal, s, neg)        # torch.where(tril, w, -1e4)
                m_n = jnp.maximum(m_p, jnp.max(s, axis=-1, keepdims=True))
                alpha = jnp.exp(m_p - m_n)
                p = jnp.exp(s - m_n)
                l_n = alpha * l_p + jnp.sum(p, axis=-1, keepdims=True)
                a_n = alpha * a_p + jnp.dot(p.astype(jnp.bfloat16), vh,
                                            preferred_element_type=jnp.float32)
                new_carry.append((m_n, l_n, a_n))
            return tuple(new_carry)

        init = tuple((jnp.full((TQ, 1), -jnp.inf, jnp.float32),
                      jnp.zeros((TQ, 1), jnp.float32),
                      jnp.zeros((TQ, D), jnp.float32))
                     for _ in range(heads_per_group))
        # causal structure: only KV tiles 0..q_idx can contain unmasked entries,
        # so strictly-upper-triangular tiles are never touched.
        carry = jax.lax.fori_loop(0, q_idx + 1, kv_step, init)

        head_outs = [(a * pl.reciprocal(l, approx=True)).astype(jnp.bfloat16)
                     for (_, l, a) in carry]
        grp_out = (head_outs[0] if heads_per_group == 1
                   else jnp.concatenate(head_outs, axis=-1))     # (TQ, GW)
        # fused merge_heads + c_proj: row slice of wproj, accumulate into output
        out_acc = out_acc + jnp.dot(grp_out, wproj_ref[c0:c0 + GW, :],
                                    preferred_element_type=jnp.float32)

    o_ref[...] = (out_acc + bproj_ref[...].astype(jnp.float32)).astype(o_ref.dtype)


def attention_ia_forward(hidden_states, params, *, n_head, scale=True):
    """hidden_states: (B, T, C) -> (B, T, C).  Matches AttentionIA.forward()[0]."""
    B, T, C = hidden_states.shape
    assert C % n_head == 0
    D = C // n_head
    TQ = T if T <= 256 else 256
    assert T % TQ == 0, "sequence length must be a multiple of the q tile"
    n_q = T // TQ
    hpg = _head_group_size(n_head, D)

    w_attn = jnp.asarray(params["c_attn_w"], jnp.float32)
    b_attn = jnp.asarray(params["c_attn_b"], jnp.float32)
    w_proj = jnp.asarray(params["c_proj_w"], jnp.float32)
    b_proj = jnp.asarray(params["c_proj_b"], jnp.float32)
    if scale:
        # fold 1/sqrt(D) into the query columns of c_attn (weight AND bias),
        # removing n_head * T * D in-kernel VPU multiplies per step.
        col_scale = jnp.concatenate(
            [jnp.full((C,), 1.0 / math.sqrt(D), jnp.float32),
             jnp.ones((2 * C,), jnp.float32)])
        w_attn = w_attn * col_scale[None, :]
        b_attn = b_attn * col_scale[None, :]
    # bf16 weights: MXU-native on v5e/v6e/v7x, half the VMEM/DMA.  Biases stay f32.
    w_attn = w_attn.astype(jnp.bfloat16)
    w_proj = w_proj.astype(jnp.bfloat16)

    kernel = functools.partial(
        _fused_attention_kernel, n_head=n_head, heads_per_group=hpg,
        q_tile=TQ, kv_tile=TQ, masked_bias=-10000.0)

    def build(single_buffer_weights):
        def const_spec(shape):
            idx_map = lambda b, q: (0,) * len(shape)
            if single_buffer_weights:
                # grid-invariant blocks: no point double-buffering them
                return pl.BlockSpec(shape, idx_map, pipeline_mode=pl.Buffered(1))
            return pl.BlockSpec(shape, idx_map)

        return pl.pallas_call(
            kernel,
            out_shape=jax.ShapeDtypeStruct((B, T, C), hidden_states.dtype),
            grid_spec=pltpu.PrefetchScalarGridSpec(
                num_scalar_prefetch=0,
                grid=(B, n_q),
                in_specs=[
                    pl.BlockSpec((None, T, C), lambda b, q: (b, 0, 0)),  # x[b]
                    const_spec((C, 3 * C)),      # c_attn W (bf16, q cols pre-scaled)
                    const_spec((1, 3 * C)),      # c_attn b (f32)
                    const_spec((C, C)),          # c_proj W (bf16)
                    const_spec((1, C)),          # c_proj b (f32)
                ],
                out_specs=pl.BlockSpec((None, TQ, C), lambda b, q: (b, q, 0)),
                scratch_shapes=[pltpu.VMEM((T, 3 * C), jnp.bfloat16)],  # resident qkv
            ),
            # batch axis parallel (v7x megacore shards it; no-op on v5e/v6e),
            # q-tile axis arbitrary (sequential: reuses the qkv scratch).
            compiler_params=pltpu.CompilerParams(
                dimension_semantics=("parallel", "arbitrary"),
                vmem_limit_bytes=_derive_vmem_limit_bytes(T, C, TQ, n_head),
            ),
        )

    args = (hidden_states, w_attn, b_attn, w_proj, b_proj)
    try:
        out = build(True)(*args)
        return jax.block_until_ready(out)
    except Exception:
        # Fallback for jax versions where pipeline_mode=pl.Buffered(1) is not
        # supported on the TPU pallas_call pipeline; identical kernel otherwise.
        return build(False)(*args)


# --------------------------------------------------------------------------
# Pure-JAX f32 reference (mirrors the PyTorch forward exactly)
# --------------------------------------------------------------------------
def reference_forward(x, params, *, n_head, scale=True):
    B, T, C = x.shape
    D = C // n_head
    qkv = x @ params["c_attn_w"] + params["c_attn_b"]
    q, k, v = jnp.split(qkv, 3, axis=-1)
    q = q.reshape(B, T, n_head, D).transpose(0, 2, 1, 3)
    k = k.reshape(B, T, n_head, D).transpose(0, 2, 1, 3)
    v = v.reshape(B, T, n_head, D).transpose(0, 2, 1, 3)
    s = jnp.einsum("bhqd,bhkd->bhqk", q, k)
    if scale:
        s = s / jnp.sqrt(jnp.float32(D))
    mask = jnp.tril(jnp.ones((T, T), dtype=bool))
    s = jnp.where(mask, s, jnp.float32(-10000.0))
    p = jax.nn.softmax(s, axis=-1)
    a = jnp.einsum("bhqk,bhkd->bhqd", p, v)
    a = a.transpose(0, 2, 1, 3).reshape(B, T, C)
    return a @ params["c_proj_w"] + params["c_proj_b"]


if __name__ == "__main__":
    # Small shapes consistent with the module: nx=n_state=32, n_ctx=T=8,
    # n_head=4 (head_dim=8), batch=2, scale=True (GPT-2 behavior).
    B, T, C, H = 2, 8, 32, 4

    key = jax.random.PRNGKey(0)
    kx, kw1, kb1, kw2, kb2 = jax.random.split(key, 5)
    x = jax.random.normal(kx, (B, T, C), dtype=jnp.float32)
    params = {
        "c_attn_w": 0.05 * jax.random.normal(kw1, (C, 3 * C), dtype=jnp.float32),
        "c_attn_b": 0.05 * jax.random.normal(kb1, (1, 3 * C), dtype=jnp.float32),
        "c_proj_w": 0.05 * jax.random.normal(kw2, (C, C), dtype=jnp.float32),
        "c_proj_b": 0.05 * jax.random.normal(kb2, (1, C), dtype=jnp.float32),
    }

    out = attention_ia_forward(x, params, n_head=H, scale=True)
    out = jax.block_until_ready(out)

    ref = reference_forward(x, params, n_head=H, scale=True)
    assert out.shape == (B, T, C)
    max_err = float(jnp.max(jnp.abs(out - ref)))
    # bf16 MXU operands vs. the f32 reference -> loosened (but still meaningful) tol
    assert jnp.allclose(out, ref, atol=2e-2, rtol=2e-2), (
        f"Pallas != reference (max abs err {max_err})")

    print("KERNEL_OK")
</pallas_src>

<mosaic_0001>
module attributes {stable_mosaic.version = 11 : i64} {
  func.func @_fused_attention_kernel(%arg0: i32, %arg1: i32, %arg2: memref<1x8x32xf32, #tpu.memory_space<vmem>>, %arg3: memref<32x96xbf16, #tpu.memory_space<vmem>>, %arg4: memref<1x96xf32, #tpu.memory_space<vmem>>, %arg5: memref<32x32xbf16, #tpu.memory_space<vmem>>, %arg6: memref<1x32xf32, #tpu.memory_space<vmem>>, %arg7: memref<1x8x32xf32, #tpu.memory_space<vmem>>, %arg8: memref<8x96xbf16, #tpu.memory_space<vmem>>) attributes {dimension_semantics = [#tpu.dimension_semantics<parallel>, #tpu.dimension_semantics<arbitrary>], iteration_bounds = array<i64: 2, 1>, scalar_prefetch = 0 : i64, scratch_operands = 1 : i64, tpu.core_type = #tpu.core_type<tc>, window_params = [{transform_indices = @transform_0, window_bounds = array<i64: 1, 8, 32>}, {pipeline_mode = #tpu.pipeline_mode<synchronous>, transform_indices = @transform_1, window_bounds = array<i64: 32, 96>}, {pipeline_mode = #tpu.pipeline_mode<synchronous>, transform_indices = @transform_2, window_bounds = array<i64: 1, 96>}, {pipeline_mode = #tpu.pipeline_mode<synchronous>, transform_indices = @transform_3, window_bounds = array<i64: 32, 32>}, {pipeline_mode = #tpu.pipeline_mode<synchronous>, transform_indices = @transform_4, window_bounds = array<i64: 1, 32>}, {transform_indices = @transform_5, window_bounds = array<i64: 1, 8, 32>}]} {
    %c0_i32 = arith.constant 0 : i32
    %0 = arith.cmpi eq, %arg1, %c0_i32 : i32
    %1 = arith.extui %0 : i1 to i32
    %c0_i32_0 = arith.constant 0 : i32
    %2 = arith.cmpi ne, %1, %c0_i32_0 : i32
    scf.if %2 {
      %c0_24 = arith.constant 0 : index
      %c0_25 = arith.constant 0 : index
      %c0_26 = arith.constant 0 : index
      %50 = vector.load %arg2[%c0_24, %c0_25, %c0_26] : memref<1x8x32xf32, #tpu.memory_space<vmem>>, vector<1x8x32xf32>
      %51 = vector.shape_cast %50 : vector<1x8x32xf32> to vector<8x32xf32>
      %52 = arith.truncf %51 : vector<8x32xf32> to vector<8x32xbf16>
      %c0_27 = arith.constant 0 : index
      %c0_28 = arith.constant 0 : index
      %53 = vector.load %arg3[%c0_27, %c0_28] : memref<32x96xbf16, #tpu.memory_space<vmem>>, vector<32x96xbf16>
      %cst_29 = arith.constant dense<0.000000e+00> : vector<8x96xf32>
      %54 = tpu.matmul %52, %53, %cst_29 {dimension_numbers = #tpu.dot_dimension_numbers<[1], [0], [0], [1], [0, 0, 1, 1], [], []>} : vector<8x32xbf16>, vector<32x96xbf16>, vector<8x96xf32> -> vector<8x96xf32>
      %c0_30 = arith.constant 0 : index
      %c0_31 = arith.constant 0 : index
      %55 = vector.load %arg4[%c0_30, %c0_31] : memref<1x96xf32, #tpu.memory_space<vmem>>, vector<1x96xf32>
      %56 = vector.broadcast %55 : vector<1x96xf32> to vector<8x96xf32>
      %57 = arith.addf %54, %56 : vector<8x96xf32>
      %58 = arith.truncf %57 : vector<8x96xf32> to vector<8x96xbf16>
      %c0_32 = arith.constant 0 : index
      %c0_33 = arith.constant 0 : index
      %59 = vector.load %arg8[%c0_32, %c0_33] : memref<8x96xbf16, #tpu.memory_space<vmem>>, vector<8x96xbf16>
      tpu.vector_store %arg8[%c0_32, %c0_33], %58 {strides = array<i32>} : memref<8x96xbf16, #tpu.memory_space<vmem>>, vector<8x96xbf16>,
    } else {
    }
    %c8_i32 = arith.constant 8 : i32
    %3 = arith.muli %arg1, %c8_i32 : i32
    %4 = tpu.assume_multiple %3, 8 : i32
    %cst = arith.constant 0.000000e+00 : f32
    %5 = vector.broadcast %cst : f32 to vector<8x32xf32>
    %6 = arith.index_cast %4 : i32 to index
    %c0 = arith.constant 0 : index
    %7 = vector.load %arg8[%6, %c0] : memref<8x96xbf16, #tpu.memory_space<vmem>>, vector<8x32xbf16>
    %cst_1 = arith.constant 0xFF800000 : f32
    %8 = vector.broadcast %cst_1 : f32 to vector<8x1xf32>
    %cst_2 = arith.constant 0.000000e+00 : f32
    %9 = vector.broadcast %cst_2 : f32 to vector<8x1xf32>
    %cst_3 = arith.constant 0.000000e+00 : f32
    %10 = vector.broadcast %cst_3 : f32 to vector<8x8xf32>
    %cst_4 = arith.constant 0xFF800000 : f32
    %11 = vector.broadcast %cst_4 : f32 to vector<8x1xf32>
    %cst_5 = arith.constant 0.000000e+00 : f32
    %12 = vector.broadcast %cst_5 : f32 to vector<8x1xf32>
    %cst_6 = arith.constant 0.000000e+00 : f32
    %13 = vector.broadcast %cst_6 : f32 to vector<8x8xf32>
    %cst_7 = arith.constant 0xFF800000 : f32
    %14 = vector.broadcast %cst_7 : f32 to vector<8x1xf32>
    %cst_8 = arith.constant 0.000000e+00 : f32
    %15 = vector.broadcast %cst_8 : f32 to vector<8x1xf32>
    %cst_9 = arith.constant 0.000000e+00 : f32
    %16 = vector.broadcast %cst_9 : f32 to vector<8x8xf32>
    %cst_10 = arith.constant 0xFF800000 : f32
    %17 = vector.broadcast %cst_10 : f32 to vector<8x1xf32>
    %cst_11 = arith.constant 0.000000e+00 : f32
    %18 = vector.broadcast %cst_11 : f32 to vector<8x1xf32>
    %cst_12 = arith.constant 0.000000e+00 : f32
    %19 = vector.broadcast %cst_12 : f32 to vector<8x8xf32>
    %c1_i32 = arith.constant 1 : i32
    %20 = arith.addi %arg1, %c1_i32 : i32
    %cst_13 = arith.constant -1.000000e+04 : f32
    %c0_i32_14 = arith.constant 0 : i32
    %21 = arith.subi %20, %c0_i32_14 : i32
    %22 = arith.addi %c0_i32_14, %21 : i32
    %c1_i32_15 = arith.constant 1 : i32
    %23:12 = scf.for %arg9 = %c0_i32_14 to %22 step %c1_i32_15 iter_args(%arg10 = %8, %arg11 = %9, %arg12 = %10, %arg13 = %11, %arg14 = %12, %arg15 = %13, %arg16 = %14, %arg17 = %15, %arg18 = %16, %arg19 = %17, %arg20 = %18, %arg21 = %19) -> (vector<8x1xf32>, vector<8x1xf32>, vector<8x8xf32>, vector<8x1xf32>, vector<8x1xf32>, vector<8x8xf32>, vector<8x1xf32>, vector<8x1xf32>, vector<8x8xf32>, vector<8x1xf32>, vector<8x1xf32>, vector<8x8xf32>)  : i32 {
      %c8_i32_24 = arith.constant 8 : i32
      %50 = arith.muli %arg9, %c8_i32_24 : i32
      %51 = tpu.assume_multiple %50, 8 : i32
      %52 = arith.index_cast %51 : i32 to index
      %c32 = arith.constant 32 : index
      %53 = vector.load %arg8[%52, %c32] : memref<8x96xbf16, #tpu.memory_space<vmem>>, vector<8x32xbf16>
      %54 = arith.index_cast %51 : i32 to index
      %c64 = arith.constant 64 : index
      %55 = vector.load %arg8[%54, %c64] : memref<8x96xbf16, #tpu.memory_space<vmem>>, vector<8x32xbf16>
      %56 = tpu.iota {dimensions = array<i32: 0>} : vector<8x8xi32>
      %57 = vector.broadcast %4 : i32 to vector<8x8xi32>
      %58 = arith.addi %57, %56 : vector<8x8xi32>
      %59 = tpu.iota {dimensions = array<i32: 1>} : vector<8x8xi32>
      %60 = vector.broadcast %51 : i32 to vector<8x8xi32>
      %61 = arith.addi %60, %59 : vector<8x8xi32>
      %62 = arith.cmpi sle, %61, %58 : vector<8x8xi32>
      %63 = vector.extract_strided_slice %7 {offsets = [0, 0], sizes = [8, 8], strides = [1, 1]} : vector<8x32xbf16> to vector<8x8xbf16>
      %64 = vector.extract_strided_slice %53 {offsets = [0, 0], sizes = [8, 8], strides = [1, 1]} : vector<8x32xbf16> to vector<8x8xbf16>
      %65 = vector.extract_strided_slice %55 {offsets = [0, 0], sizes = [8, 8], strides = [1, 1]} : vector<8x32xbf16> to vector<8x8xbf16>
      %cst_25 = arith.constant dense<0.000000e+00> : vector<8x8xf32>
      %66 = tpu.matmul %63, %64, %cst_25 {dimension_numbers = #tpu.dot_dimension_numbers<[1], [1], [0], [0], [0, 0, 1, 0], [], []>} : vector<8x8xbf16>, vector<8x8xbf16>, vector<8x8xf32> -> vector<8x8xf32>
      %67 = vector.broadcast %cst_13 : f32 to vector<8x8xf32>
      %68 = arith.select %62, %66, %67 : vector<8x8xi1>, vector<8x8xf32>
      %cst_26 = arith.constant dense<0xFF800000> : vector<8xf32>
      %69 = vector.multi_reduction <maximumf>, %68, %cst_26 [1] : vector<8x8xf32> to vector<8xf32>
      %70 = vector.shape_cast %69 : vector<8xf32> to vector<8x1xf32>
      %71 = arith.maximumf %arg10, %70 : vector<8x1xf32>
      %72 = arith.subf %arg10, %71 : vector<8x1xf32>
      %73 = math.exp %72 : vector<8x1xf32>
      %74 = vector.broadcast %71 : vector<8x1xf32> to vector<8x8xf32>
      %75 = arith.subf %68, %74 : vector<8x8xf32>
      %76 = math.exp %75 : vector<8x8xf32>
      %77 = arith.mulf %73, %arg11 : vector<8x1xf32>
      %cst_27 = arith.constant dense<0.000000e+00> : vector<8xf32>
      %78 = vector.multi_reduction <add>, %76, %cst_27 [1] : vector<8x8xf32> to vector<8xf32>
      %79 = vector.shape_cast %78 : vector<8xf32> to vector<8x1xf32>
      %80 = arith.addf %77, %79 : vector<8x1xf32>
      %81 = vector.broadcast %73 : vector<8x1xf32> to vector<8x8xf32>
      %82 = arith.mulf %81, %arg12 : vector<8x8xf32>
      %83 = arith.truncf %76 : vector<8x8xf32> to vector<8x8xbf16>
      %cst_28 = arith.constant dense<0.000000e+00> : vector<8x8xf32>
      %84 = tpu.matmul %83, %65, %cst_28 {dimension_numbers = #tpu.dot_dimension_numbers<[1], [0], [0], [1], [0, 0, 1, 1], [], []>} : vector<8x8xbf16>, vector<8x8xbf16>, vector<8x8xf32> -> vector<8x8xf32>
      %85 = arith.addf %82, %84 : vector<8x8xf32>
      %86 = vector.extract_strided_slice %7 {offsets = [0, 8], sizes = [8, 8], strides = [1, 1]} : vector<8x32xbf16> to vector<8x8xbf16>
      %87 = vector.extract_strided_slice %53 {offsets = [0, 8], sizes = [8, 8], strides = [1, 1]} : vector<8x32xbf16> to vector<8x8xbf16>
      %88 = vector.extract_strided_slice %55 {offsets = [0, 8], sizes = [8, 8], strides = [1, 1]} : vector<8x32xbf16> to vector<8x8xbf16>
      %cst_29 = arith.constant dense<0.000000e+00> : vector<8x8xf32>
      %89 = tpu.matmul %86, %87, %cst_29 {dimension_numbers = #tpu.dot_dimension_numbers<[1], [1], [0], [0], [0, 0, 1, 0], [], []>} : vector<8x8xbf16>, vector<8x8xbf16>, vector<8x8xf32> -> vector<8x8xf32>
      %90 = vector.broadcast %cst_13 : f32 to vector<8x8xf32>
      %91 = arith.select %62, %89, %90 : vector<8x8xi1>, vector<8x8xf32>
      %cst_30 = arith.constant dense<0xFF800000> : vector<8xf32>
      %92 = vector.multi_reduction <maximumf>, %91, %cst_30 [1] : vector<8x8xf32> to vector<8xf32>
      %93 = vector.shape_cast %92 : vector<8xf32> to vector<8x1xf32>
      %94 = arith.maximumf %arg13, %93 : vector<8x1xf32>
      %95 = arith.subf %arg13, %94 : vector<8x1xf32>
      %96 = math.exp %95 : vector<8x1xf32>
      %97 = vector.broadcast %94 : vector<8x1xf32> to vector<8x8xf32>
      %98 = arith.subf %91, %97 : vector<8x8xf32>
      %99 = math.exp %98 : vector<8x8xf32>
      %100 = arith.mulf %96, %arg14 : vector<8x1xf32>
      %cst_31 = arith.constant dense<0.000000e+00> : vector<8xf32>
      %101 = vector.multi_reduction <add>, %99, %cst_31 [1] : vector<8x8xf32> to vector<8xf32>
      %102 = vector.shape_cast %101 : vector<8xf32> to vector<8x1xf32>
      %103 = arith.addf %100, %102 : vector<8x1xf32>
      %104 = vector.broadcast %96 : vector<8x1xf32> to vector<8x8xf32>
      %105 = arith.mulf %104, %arg15 : vector<8x8xf32>
      %106 = arith.truncf %99 : vector<8x8xf32> to vector<8x8xbf16>
      %cst_32 = arith.constant dense<0.000000e+00> : vector<8x8xf32>
      %107 = tpu.matmul %106, %88, %cst_32 {dimension_numbers = #tpu.dot_dimension_numbers<[1], [0], [0], [1], [0, 0, 1, 1], [], []>} : vector<8x8xbf16>, vector<8x8xbf16>, vector<8x8xf32> -> vector<8x8xf32>
      %108 = arith.addf %105, %107 : vector<8x8xf32>
      %109 = vector.extract_strided_slice %7 {offsets = [0, 16], sizes = [8, 8], strides = [1, 1]} : vector<8x32xbf16> to vector<8x8xbf16>
      %110 = vector.extract_strided_slice %53 {offsets = [0, 16], sizes = [8, 8], strides = [1, 1]} : vector<8x32xbf16> to vector<8x8xbf16>
      %111 = vector.extract_strided_slice %55 {offsets = [0, 16], sizes = [8, 8], strides = [1, 1]} : vector<8x32xbf16> to vector<8x8xbf16>
      %cst_33 = arith.constant dense<0.000000e+00> : vector<8x8xf32>
      %112 = tpu.matmul %109, %110, %cst_33 {dimension_numbers = #tpu.dot_dimension_numbers<[1], [1], [0], [0], [0, 0, 1, 0], [], []>} : vector<8x8xbf16>, vector<8x8xbf16>, vector<8x8xf32> -> vector<8x8xf32>
      %113 = vector.broadcast %cst_13 : f32 to vector<8x8xf32>
      %114 = arith.select %62, %112, %113 : vector<8x8xi1>, vector<8x8xf32>
      %cst_34 = arith.constant dense<0xFF800000> : vector<8xf32>
      %115 = vector.multi_reduction <maximumf>, %114, %cst_34 [1] : vector<8x8xf32> to vector<8xf32>
      %116 = vector.shape_cast %115 : vector<8xf32> to vector<8x1xf32>
      %117 = arith.maximumf %arg16, %116 : vector<8x1xf32>
      %118 = arith.subf %arg16, %117 : vector<8x1xf32>
      %119 = math.exp %118 : vector<8x1xf32>
      %120 = vector.broadcast %117 : vector<8x1xf32> to vector<8x8xf32>
      %121 = arith.subf %114, %120 : vector<8x8xf32>
      %122 = math.exp %121 : vector<8x8xf32>
      %123 = arith.mulf %119, %arg17 : vector<8x1xf32>
      %cst_35 = arith.constant dense<0.000000e+00> : vector<8xf32>
      %124 = vector.multi_reduction <add>, %122, %cst_35 [1] : vector<8x8xf32> to vector<8xf32>
      %125 = vector.shape_cast %124 : vector<8xf32> to vector<8x1xf32>
      %126 = arith.addf %123, %125 : vector<8x1xf32>
      %127 = vector.broadcast %119 : vector<8x1xf32> to vector<8x8xf32>
      %128 = arith.mulf %127, %arg18 : vector<8x8xf32>
      %129 = arith.truncf %122 : vector<8x8xf32> to vector<8x8xbf16>
      %cst_36 = arith.constant dense<0.000000e+00> : vector<8x8xf32>
      %130 = tpu.matmul %129, %111, %cst_36 {dimension_numbers = #tpu.dot_dimension_numbers<[1], [0], [0], [1], [0, 0, 1, 1], [], []>} : vector<8x8xbf16>, vector<8x8xbf16>, vector<8x8xf32> -> vector<8x8xf32>
      %131 = arith.addf %128, %130 : vector<8x8xf32>
      %132 = vector.extract_strided_slice %7 {offsets = [0, 24], sizes = [8, 8], strides = [1, 1]} : vector<8x32xbf16> to vector<8x8xbf16>
      %133 = vector.extract_strided_slice %53 {offsets = [0, 24], sizes = [8, 8], strides = [1, 1]} : vector<8x32xbf16> to vector<8x8xbf16>
      %134 = vector.extract_strided_slice %55 {offsets = [0, 24], sizes = [8, 8], strides = [1, 1]} : vector<8x32xbf16> to vector<8x8xbf16>
      %cst_37 = arith.constant dense<0.000000e+00> : vector<8x8xf32>
      %135 = tpu.matmul %132, %133, %cst_37 {dimension_numbers = #tpu.dot_dimension_numbers<[1], [1], [0], [0], [0, 0, 1, 0], [], []>} : vector<8x8xbf16>, vector<8x8xbf16>, vector<8x8xf32> -> vector<8x8xf32>
      %136 = vector.broadcast %cst_13 : f32 to vector<8x8xf32>
      %137 = arith.select %62, %135, %136 : vector<8x8xi1>, vector<8x8xf32>
      %cst_38 = arith.constant dense<0xFF800000> : vector<8xf32>
      %138 = vector.multi_reduction <maximumf>, %137, %cst_38 [1] : vector<8x8xf32> to vector<8xf32>
      %139 = vector.shape_cast %138 : vector<8xf32> to vector<8x1xf32>
      %140 = arith.maximumf %arg19, %139 : vector<8x1xf32>
      %141 = arith.subf %arg19, %140 : vector<8x1xf32>
      %142 = math.exp %141 : vector<8x1xf32>
      %143 = vector.broadcast %140 : vector<8x1xf32> to vector<8x8xf32>
      %144 = arith.subf %137, %143 : vector<8x8xf32>
      %145 = math.exp %144 : vector<8x8xf32>
      %146 = arith.mulf %142, %arg20 : vector<8x1xf32>
      %cst_39 = arith.constant dense<0.000000e+00> : vector<8xf32>
      %147 = vector.multi_reduction <add>, %145, %cst_39 [1] : vector<8x8xf32> to vector<8xf32>
      %148 = vector.shape_cast %147 : vector<8xf32> to vector<8x1xf32>
      %149 = arith.addf %146, %148 : vector<8x1xf32>
      %150 = vector.broadcast %142 : vector<8x1xf32> to vector<8x8xf32>
      %151 = arith.mulf %150, %arg21 : vector<8x8xf32>
      %152 = arith.truncf %145 : vector<8x8xf32> to vector<8x8xbf16>
      %cst_40 = arith.constant dense<0.000000e+00> : vector<8x8xf32>
      %153 = tpu.matmul %152, %134, %cst_40 {dimension_numbers = #tpu.dot_dimension_numbers<[1], [0], [0], [1], [0, 0, 1, 1], [], []>} : vector<8x8xbf16>, vector<8x8xbf16>, vector<8x8xf32> -> vector<8x8xf32>
      %154 = arith.addf %151, %153 : vector<8x8xf32>
      scf.yield %71, %80, %85, %94, %103, %108, %117, %126, %131, %140, %149, %154 : vector<8x1xf32>, vector<8x1xf32>, vector<8x8xf32>, vector<8x1xf32>, vector<8x1xf32>, vector<8x8xf32>, vector<8x1xf32>, vector<8x1xf32>, vector<8x8xf32>, vector<8x1xf32>, vector<8x1xf32>, vector<8x8xf32>
    }
    %24 = tpu.reciprocal %23#1 {approx = true} : vector<8x1xf32> -> vector<8x1xf32>
    %25 = vector.broadcast %24 : vector<8x1xf32> to vector<8x8xf32>
    %26 = arith.mulf %23#2, %25 : vector<8x8xf32>
    %27 = arith.truncf %26 : vector<8x8xf32> to vector<8x8xbf16>
    %28 = tpu.reciprocal %23#4 {approx = true} : vector<8x1xf32> -> vector<8x1xf32>
    %29 = vector.broadcast %28 : vector<8x1xf32> to vector<8x8xf32>
    %30 = arith.mulf %23#5, %29 : vector<8x8xf32>
    %31 = arith.truncf %30 : vector<8x8xf32> to vector<8x8xbf16>
    %32 = tpu.reciprocal %23#7 {approx = true} : vector<8x1xf32> -> vector<8x1xf32>
    %33 = vector.broadcast %32 : vector<8x1xf32> to vector<8x8xf32>
    %34 = arith.mulf %23#8, %33 : vector<8x8xf32>
    %35 = arith.truncf %34 : vector<8x8xf32> to vector<8x8xbf16>
    %36 = tpu.reciprocal %23#10 {approx = true} : vector<8x1xf32> -> vector<8x1xf32>
    %37 = vector.broadcast %36 : vector<8x1xf32> to vector<8x8xf32>
    %38 = arith.mulf %23#11, %37 : vector<8x8xf32>
    %39 = arith.truncf %38 : vector<8x8xf32> to vector<8x8xbf16>
    %40 = tpu.concatenate %27, %31, %35, %39 in 1 : vector<8x8xbf16>, vector<8x8xbf16>, vector<8x8xbf16>, vector<8x8xbf16> -> vector<8x32xbf16>
    %c0_16 = arith.constant 0 : index
    %c0_17 = arith.constant 0 : index
    %41 = vector.load %arg5[%c0_16, %c0_17] : memref<32x32xbf16, #tpu.memory_space<vmem>>, vector<32x32xbf16>
    %cst_18 = arith.constant dense<0.000000e+00> : vector<8x32xf32>
    %42 = tpu.matmul %40, %41, %cst_18 {dimension_numbers = #tpu.dot_dimension_numbers<[1], [0], [0], [1], [0, 0, 1, 1], [], []>} : vector<8x32xbf16>, vector<32x32xbf16>, vector<8x32xf32> -> vector<8x32xf32>
    %43 = arith.addf %5, %42 : vector<8x32xf32>
    %c0_19 = arith.constant 0 : index
    %c0_20 = arith.constant 0 : index
    %44 = vector.load %arg6[%c0_19, %c0_20] : memref<1x32xf32, #tpu.memory_space<vmem>>, vector<1x32xf32>
    %45 = vector.broadcast %44 : vector<1x32xf32> to vector<8x32xf32>
    %46 = arith.addf %43, %45 : vector<8x32xf32>
    %c0_21 = arith.constant 0 : index
    %c0_22 = arith.constant 0 : index
    %c0_23 = arith.constant 0 : index
    %47 = vector.load %arg7[%c0_21, %c0_22, %c0_23] : memref<1x8x32xf32, #tpu.memory_space<vmem>>, vector<1x8x32xf32>
    %48 = vector.shape_cast %47 : vector<1x8x32xf32> to vector<8x32xf32>
    %49 = vector.shape_cast %46 : vector<8x32xf32> to vector<1x8x32xf32>
    tpu.vector_store %arg7[%c0_21, %c0_22, %c0_23], %49 {strides = array<i32>} : memref<1x8x32xf32, #tpu.memory_space<vmem>>, vector<1x8x32xf32>,
    return
  }
  func.func @transform_0(%arg0: i32, %arg1: i32) -> (i32, i32, i32) {
    %c0_i32 = arith.constant 0 : i32
    %c0_i32_0 = arith.constant 0 : i32
    %c0_i32_1 = arith.constant 0 : i32
    return %arg0, %c0_i32, %c0_i32_0 : i32, i32, i32
  }
  func.func @transform_1(%arg0: i32, %arg1: i32) -> (i32, i32) {
    %c0_i32 = arith.constant 0 : i32
    %c0_i32_0 = arith.constant 0 : i32
    %c0_i32_1 = arith.constant 0 : i32
    return %c0_i32, %c0_i32_0 : i32, i32
  }
  func.func @transform_2(%arg0: i32, %arg1: i32) -> (i32, i32) {
    %c0_i32 = arith.constant 0 : i32
    %c0_i32_0 = arith.constant 0 : i32
    %c0_i32_1 = arith.constant 0 : i32
    return %c0_i32, %c0_i32_0 : i32, i32
  }
  func.func @transform_3(%arg0: i32, %arg1: i32) -> (i32, i32) {
    %c0_i32 = arith.constant 0 : i32
    %c0_i32_0 = arith.constant 0 : i32
    %c0_i32_1 = arith.constant 0 : i32
    return %c0_i32, %c0_i32_0 : i32, i32
  }
  func.func @transform_4(%arg0: i32, %arg1: i32) -> (i32, i32) {
    %c0_i32 = arith.constant 0 : i32
    %c0_i32_0 = arith.constant 0 : i32
    %c0_i32_1 = arith.constant 0 : i32
    return %c0_i32, %c0_i32_0 : i32, i32
  }
  func.func @transform_5(%arg0: i32, %arg1: i32) -> (i32, i32, i32) {
    %c0_i32 = arith.constant 0 : i32
    %c0_i32_0 = arith.constant 0 : i32
    return %arg0, %arg1, %c0_i32 : i32, i32, i32
  }
}

module attributes {stable_mosaic.version = 11 : i64} {
  func.func @_fused_attention_kernel(%arg0: i32, %arg1: i32, %arg2: memref<1x8x32xf32, #tpu.memory_space<vmem>>, %arg3: memref<32x96xbf16, #tpu.memory_space<vmem>>, %arg4: memref<1x96xf32, #tpu.memory_space<vmem>>, %arg5: memref<32x32xbf16, #tpu.memory_space<vmem>>, %arg6: memref<1x32xf32, #tpu.memory_space<vmem>>, %arg7: memref<1x8x32xf32, #tpu.memory_space<vmem>>, %arg8: memref<8x96xbf16, #tpu.memory_space<vmem>>) attributes {dimension_semantics = [#tpu.dimension_semantics<parallel>, #tpu.dimension_semantics<arbitrary>], iteration_bounds = array<i64: 2, 1>, scalar_prefetch = 0 : i64, scratch_operands = 1 : i64, tpu.core_type = #tpu.core_type<tc>, window_params = [{transform_indices = @transform_0, window_bounds = array<i64: 1, 8, 32>}, {pipeline_mode = #tpu.pipeline_mode<synchronous>, transform_indices = @transform_1, window_bounds = array<i64: 32, 96>}, {pipeline_mode = #tpu.pipeline_mode<synchronous>, transform_indices = @transform_2, window_bounds = array<i64: 1, 96>}, {pipeline_mode = #tpu.pipeline_mode<synchronous>, transform_indices = @transform_3, window_bounds = array<i64: 32, 32>}, {pipeline_mode = #tpu.pipeline_mode<synchronous>, transform_indices = @transform_4, window_bounds = array<i64: 1, 32>}, {transform_indices = @transform_5, window_bounds = array<i64: 1, 8, 32>}]} {
    %c0_i32 = arith.constant 0 : i32
    %0 = arith.cmpi eq, %arg1, %c0_i32 : i32
    %1 = arith.extui %0 : i1 to i32
    %c0_i32_0 = arith.constant 0 : i32
    %2 = arith.cmpi ne, %1, %c0_i32_0 : i32
    scf.if %2 {
      %c0_24 = arith.constant 0 : index
      %c0_25 = arith.constant 0 : index
      %c0_26 = arith.constant 0 : index
      %50 = vector.load %arg2[%c0_24, %c0_25, %c0_26] : memref<1x8x32xf32, #tpu.memory_space<vmem>>, vector<1x8x32xf32>
      %51 = vector.shape_cast %50 : vector<1x8x32xf32> to vector<8x32xf32>
      %52 = arith.truncf %51 : vector<8x32xf32> to vector<8x32xbf16>
      %c0_27 = arith.constant 0 : index
      %c0_28 = arith.constant 0 : index
      %53 = vector.load %arg3[%c0_27, %c0_28] : memref<32x96xbf16, #tpu.memory_space<vmem>>, vector<32x96xbf16>
      %cst_29 = arith.constant dense<0.000000e+00> : vector<8x96xf32>
      %54 = tpu.matmul %52, %53, %cst_29 {dimension_numbers = #tpu.dot_dimension_numbers<[1], [0], [0], [1], [0, 0, 1, 1], [], []>} : vector<8x32xbf16>, vector<32x96xbf16>, vector<8x96xf32> -> vector<8x96xf32>
      %c0_30 = arith.constant 0 : index
      %c0_31 = arith.constant 0 : index
      %55 = vector.load %arg4[%c0_30, %c0_31] : memref<1x96xf32, #tpu.memory_space<vmem>>, vector<1x96xf32>
      %56 = vector.broadcast %55 : vector<1x96xf32> to vector<8x96xf32>
      %57 = arith.addf %54, %56 : vector<8x96xf32>
      %58 = arith.truncf %57 : vector<8x96xf32> to vector<8x96xbf16>
      %c0_32 = arith.constant 0 : index
      %c0_33 = arith.constant 0 : index
      %59 = vector.load %arg8[%c0_32, %c0_33] : memref<8x96xbf16, #tpu.memory_space<vmem>>, vector<8x96xbf16>
      tpu.vector_store %arg8[%c0_32, %c0_33], %58 {strides = array<i32>} : memref<8x96xbf16, #tpu.memory_space<vmem>>, vector<8x96xbf16>,
    } else {
    }
    %c8_i32 = arith.constant 8 : i32
    %3 = arith.muli %arg1, %c8_i32 : i32
    %4 = tpu.assume_multiple %3, 8 : i32
    %cst = arith.constant 0.000000e+00 : f32
    %5 = vector.broadcast %cst : f32 to vector<8x32xf32>
    %6 = arith.index_cast %4 : i32 to index
    %c0 = arith.constant 0 : index
    %7 = vector.load %arg8[%6, %c0] : memref<8x96xbf16, #tpu.memory_space<vmem>>, vector<8x32xbf16>
    %cst_1 = arith.constant 0xFF800000 : f32
    %8 = vector.broadcast %cst_1 : f32 to vector<8x1xf32>
    %cst_2 = arith.constant 0.000000e+00 : f32
    %9 = vector.broadcast %cst_2 : f32 to vector<8x1xf32>
    %cst_3 = arith.constant 0.000000e+00 : f32
    %10 = vector.broadcast %cst_3 : f32 to vector<8x8xf32>
    %cst_4 = arith.constant 0xFF800000 : f32
    %11 = vector.broadcast %cst_4 : f32 to vector<8x1xf32>
    %cst_5 = arith.constant 0.000000e+00 : f32
    %12 = vector.broadcast %cst_5 : f32 to vector<8x1xf32>
    %cst_6 = arith.constant 0.000000e+00 : f32
    %13 = vector.broadcast %cst_6 : f32 to vector<8x8xf32>
    %cst_7 = arith.constant 0xFF800000 : f32
    %14 = vector.broadcast %cst_7 : f32 to vector<8x1xf32>
    %cst_8 = arith.constant 0.000000e+00 : f32
    %15 = vector.broadcast %cst_8 : f32 to vector<8x1xf32>
    %cst_9 = arith.constant 0.000000e+00 : f32
    %16 = vector.broadcast %cst_9 : f32 to vector<8x8xf32>
    %cst_10 = arith.constant 0xFF800000 : f32
    %17 = vector.broadcast %cst_10 : f32 to vector<8x1xf32>
    %cst_11 = arith.constant 0.000000e+00 : f32
    %18 = vector.broadcast %cst_11 : f32 to vector<8x1xf32>
    %cst_12 = arith.constant 0.000000e+00 : f32
    %19 = vector.broadcast %cst_12 : f32 to vector<8x8xf32>
    %c1_i32 = arith.constant 1 : i32
    %20 = arith.addi %arg1, %c1_i32 : i32
    %cst_13 = arith.constant -1.000000e+04 : f32
    %c0_i32_14 = arith.constant 0 : i32
    %21 = arith.subi %20, %c0_i32_14 : i32
    %22 = arith.addi %c0_i32_14, %21 : i32
    %c1_i32_15 = arith.constant 1 : i32
    %23:12 = scf.for %arg9 = %c0_i32_14 to %22 step %c1_i32_15 iter_args(%arg10 = %8, %arg11 = %9, %arg12 = %10, %arg13 = %11, %arg14 = %12, %arg15 = %13, %arg16 = %14, %arg17 = %15, %arg18 = %16, %arg19 = %17, %arg20 = %18, %arg21 = %19) -> (vector<8x1xf32>, vector<8x1xf32>, vector<8x8xf32>, vector<8x1xf32>, vector<8x1xf32>, vector<8x8xf32>, vector<8x1xf32>, vector<8x1xf32>, vector<8x8xf32>, vector<8x1xf32>, vector<8x1xf32>, vector<8x8xf32>)  : i32 {
      %c8_i32_24 = arith.constant 8 : i32
      %50 = arith.muli %arg9, %c8_i32_24 : i32
      %51 = tpu.assume_multiple %50, 8 : i32
      %52 = arith.index_cast %51 : i32 to index
      %c32 = arith.constant 32 : index
      %53 = vector.load %arg8[%52, %c32] : memref<8x96xbf16, #tpu.memory_space<vmem>>, vector<8x32xbf16>
      %54 = arith.index_cast %51 : i32 to index
      %c64 = arith.constant 64 : index
      %55 = vector.load %arg8[%54, %c64] : memref<8x96xbf16, #tpu.memory_space<vmem>>, vector<8x32xbf16>
      %56 = tpu.iota {dimensions = array<i32: 0>} : vector<8x8xi32>
      %57 = vector.broadcast %4 : i32 to vector<8x8xi32>
      %58 = arith.addi %57, %56 : vector<8x8xi32>
      %59 = tpu.iota {dimensions = array<i32: 1>} : vector<8x8xi32>
      %60 = vector.broadcast %51 : i32 to vector<8x8xi32>
      %61 = arith.addi %60, %59 : vector<8x8xi32>
      %62 = arith.cmpi sle, %61, %58 : vector<8x8xi32>
      %63 = vector.extract_strided_slice %7 {offsets = [0, 0], sizes = [8, 8], strides = [1, 1]} : vector<8x32xbf16> to vector<8x8xbf16>
      %64 = vector.extract_strided_slice %53 {offsets = [0, 0], sizes = [8, 8], strides = [1, 1]} : vector<8x32xbf16> to vector<8x8xbf16>
      %65 = vector.extract_strided_slice %55 {offsets = [0, 0], sizes = [8, 8], strides = [1, 1]} : vector<8x32xbf16> to vector<8x8xbf16>
      %cst_25 = arith.constant dense<0.000000e+00> : vector<8x8xf32>
      %66 = tpu.matmul %63, %64, %cst_25 {dimension_numbers = #tpu.dot_dimension_numbers<[1], [1], [0], [0], [0, 0, 1, 0], [], []>} : vector<8x8xbf16>, vector<8x8xbf16>, vector<8x8xf32> -> vector<8x8xf32>
      %67 = vector.broadcast %cst_13 : f32 to vector<8x8xf32>
      %68 = arith.select %62, %66, %67 : vector<8x8xi1>, vector<8x8xf32>
      %cst_26 = arith.constant dense<0xFF800000> : vector<8xf32>
      %69 = vector.multi_reduction <maximumf>, %68, %cst_26 [1] : vector<8x8xf32> to vector<8xf32>
      %70 = vector.shape_cast %69 : vector<8xf32> to vector<8x1xf32>
      %71 = arith.maximumf %arg10, %70 : vector<8x1xf32>
      %72 = arith.subf %arg10, %71 : vector<8x1xf32>
      %73 = math.exp %72 : vector<8x1xf32>
      %74 = vector.broadcast %71 : vector<8x1xf32> to vector<8x8xf32>
      %75 = arith.subf %68, %74 : vector<8x8xf32>
      %76 = math.exp %75 : vector<8x8xf32>
      %77 = arith.mulf %73, %arg11 : vector<8x1xf32>
      %cst_27 = arith.constant dense<0.000000e+00> : vector<8xf32>
      %78 = vector.multi_reduction <add>, %76, %cst_27 [1] : vector<8x8xf32> to vector<8xf32>
      %79 = vector.shape_cast %78 : vector<8xf32> to vector<8x1xf32>
      %80 = arith.addf %77, %79 : vector<8x1xf32>
      %81 = vector.broadcast %73 : vector<8x1xf32> to vector<8x8xf32>
      %82 = arith.mulf %81, %arg12 : vector<8x8xf32>
      %83 = arith.truncf %76 : vector<8x8xf32> to vector<8x8xbf16>
      %cst_28 = arith.constant dense<0.000000e+00> : vector<8x8xf32>
      %84 = tpu.matmul %83, %65, %cst_28 {dimension_numbers = #tpu.dot_dimension_numbers<[1], [0], [0], [1], [0, 0, 1, 1], [], []>} : vector<8x8xbf16>, vector<8x8xbf16>, vector<8x8xf32> -> vector<8x8xf32>
      %85 = arith.addf %82, %84 : vector<8x8xf32>
      %86 = vector.extract_strided_slice %7 {offsets = [0, 8], sizes = [8, 8], strides = [1, 1]} : vector<8x32xbf16> to vector<8x8xbf16>
      %87 = vector.extract_strided_slice %53 {offsets = [0, 8], sizes = [8, 8], strides = [1, 1]} : vector<8x32xbf16> to vector<8x8xbf16>
      %88 = vector.extract_strided_slice %55 {offsets = [0, 8], sizes = [8, 8], strides = [1, 1]} : vector<8x32xbf16> to vector<8x8xbf16>
      %cst_29 = arith.constant dense<0.000000e+00> : vector<8x8xf32>
      %89 = tpu.matmul %86, %87, %cst_29 {dimension_numbers = #tpu.dot_dimension_numbers<[1], [1], [0], [0], [0, 0, 1, 0], [], []>} : vector<8x8xbf16>, vector<8x8xbf16>, vector<8x8xf32> -> vector<8x8xf32>
      %90 = vector.broadcast %cst_13 : f32 to vector<8x8xf32>
      %91 = arith.select %62, %89, %90 : vector<8x8xi1>, vector<8x8xf32>
      %cst_30 = arith.constant dense<0xFF800000> : vector<8xf32>
      %92 = vector.multi_reduction <maximumf>, %91, %cst_30 [1] : vector<8x8xf32> to vector<8xf32>
      %93 = vector.shape_cast %92 : vector<8xf32> to vector<8x1xf32>
      %94 = arith.maximumf %arg13, %93 : vector<8x1xf32>
      %95 = arith.subf %arg13, %94 : vector<8x1xf32>
      %96 = math.exp %95 : vector<8x1xf32>
      %97 = vector.broadcast %94 : vector<8x1xf32> to vector<8x8xf32>
      %98 = arith.subf %91, %97 : vector<8x8xf32>
      %99 = math.exp %98 : vector<8x8xf32>
      %100 = arith.mulf %96, %arg14 : vector<8x1xf32>
      %cst_31 = arith.constant dense<0.000000e+00> : vector<8xf32>
      %101 = vector.multi_reduction <add>, %99, %cst_31 [1] : vector<8x8xf32> to vector<8xf32>
      %102 = vector.shape_cast %101 : vector<8xf32> to vector<8x1xf32>
      %103 = arith.addf %100, %102 : vector<8x1xf32>
      %104 = vector.broadcast %96 : vector<8x1xf32> to vector<8x8xf32>
      %105 = arith.mulf %104, %arg15 : vector<8x8xf32>
      %106 = arith.truncf %99 : vector<8x8xf32> to vector<8x8xbf16>
      %cst_32 = arith.constant dense<0.000000e+00> : vector<8x8xf32>
      %107 = tpu.matmul %106, %88, %cst_32 {dimension_numbers = #tpu.dot_dimension_numbers<[1], [0], [0], [1], [0, 0, 1, 1], [], []>} : vector<8x8xbf16>, vector<8x8xbf16>, vector<8x8xf32> -> vector<8x8xf32>
      %108 = arith.addf %105, %107 : vector<8x8xf32>
      %109 = vector.extract_strided_slice %7 {offsets = [0, 16], sizes = [8, 8], strides = [1, 1]} : vector<8x32xbf16> to vector<8x8xbf16>
      %110 = vector.extract_strided_slice %53 {offsets = [0, 16], sizes = [8, 8], strides = [1, 1]} : vector<8x32xbf16> to vector<8x8xbf16>
      %111 = vector.extract_strided_slice %55 {offsets = [0, 16], sizes = [8, 8], strides = [1, 1]} : vector<8x32xbf16> to vector<8x8xbf16>
      %cst_33 = arith.constant dense<0.000000e+00> : vector<8x8xf32>
      %112 = tpu.matmul %109, %110, %cst_33 {dimension_numbers = #tpu.dot_dimension_numbers<[1], [1], [0], [0], [0, 0, 1, 0], [], []>} : vector<8x8xbf16>, vector<8x8xbf16>, vector<8x8xf32> -> vector<8x8xf32>
      %113 = vector.broadcast %cst_13 : f32 to vector<8x8xf32>
      %114 = arith.select %62, %112, %113 : vector<8x8xi1>, vector<8x8xf32>
      %cst_34 = arith.constant dense<0xFF800000> : vector<8xf32>
      %115 = vector.multi_reduction <maximumf>, %114, %cst_34 [1] : vector<8x8xf32> to vector<8xf32>
      %116 = vector.shape_cast %115 : vector<8xf32> to vector<8x1xf32>
      %117 = arith.maximumf %arg16, %116 : vector<8x1xf32>
      %118 = arith.subf %arg16, %117 : vector<8x1xf32>
      %119 = math.exp %118 : vector<8x1xf32>
      %120 = vector.broadcast %117 : vector<8x1xf32> to vector<8x8xf32>
      %121 = arith.subf %114, %120 : vector<8x8xf32>
      %122 = math.exp %121 : vector<8x8xf32>
      %123 = arith.mulf %119, %arg17 : vector<8x1xf32>
      %cst_35 = arith.constant dense<0.000000e+00> : vector<8xf32>
      %124 = vector.multi_reduction <add>, %122, %cst_35 [1] : vector<8x8xf32> to vector<8xf32>
      %125 = vector.shape_cast %124 : vector<8xf32> to vector<8x1xf32>
      %126 = arith.addf %123, %125 : vector<8x1xf32>
      %127 = vector.broadcast %119 : vector<8x1xf32> to vector<8x8xf32>
      %128 = arith.mulf %127, %arg18 : vector<8x8xf32>
      %129 = arith.truncf %122 : vector<8x8xf32> to vector<8x8xbf16>
      %cst_36 = arith.constant dense<0.000000e+00> : vector<8x8xf32>
      %130 = tpu.matmul %129, %111, %cst_36 {dimension_numbers = #tpu.dot_dimension_numbers<[1], [0], [0], [1], [0, 0, 1, 1], [], []>} : vector<8x8xbf16>, vector<8x8xbf16>, vector<8x8xf32> -> vector<8x8xf32>
      %131 = arith.addf %128, %130 : vector<8x8xf32>
      %132 = vector.extract_strided_slice %7 {offsets = [0, 24], sizes = [8, 8], strides = [1, 1]} : vector<8x32xbf16> to vector<8x8xbf16>
      %133 = vector.extract_strided_slice %53 {offsets = [0, 24], sizes = [8, 8], strides = [1, 1]} : vector<8x32xbf16> to vector<8x8xbf16>
      %134 = vector.extract_strided_slice %55 {offsets = [0, 24], sizes = [8, 8], strides = [1, 1]} : vector<8x32xbf16> to vector<8x8xbf16>
      %cst_37 = arith.constant dense<0.000000e+00> : vector<8x8xf32>
      %135 = tpu.matmul %132, %133, %cst_37 {dimension_numbers = #tpu.dot_dimension_numbers<[1], [1], [0], [0], [0, 0, 1, 0], [], []>} : vector<8x8xbf16>, vector<8x8xbf16>, vector<8x8xf32> -> vector<8x8xf32>
      %136 = vector.broadcast %cst_13 : f32 to vector<8x8xf32>
      %137 = arith.select %62, %135, %136 : vector<8x8xi1>, vector<8x8xf32>
      %cst_38 = arith.constant dense<0xFF800000> : vector<8xf32>
      %138 = vector.multi_reduction <maximumf>, %137, %cst_38 [1] : vector<8x8xf32> to vector<8xf32>
      %139 = vector.shape_cast %138 : vector<8xf32> to vector<8x1xf32>
      %140 = arith.maximumf %arg19, %139 : vector<8x1xf32>
      %141 = arith.subf %arg19, %140 : vector<8x1xf32>
      %142 = math.exp %141 : vector<8x1xf32>
      %143 = vector.broadcast %140 : vector<8x1xf32> to vector<8x8xf32>
      %144 = arith.subf %137, %143 : vector<8x8xf32>
      %145 = math.exp %144 : vector<8x8xf32>
      %146 = arith.mulf %142, %arg20 : vector<8x1xf32>
      %cst_39 = arith.constant dense<0.000000e+00> : vector<8xf32>
      %147 = vector.multi_reduction <add>, %145, %cst_39 [1] : vector<8x8xf32> to vector<8xf32>
      %148 = vector.shape_cast %147 : vector<8xf32> to vector<8x1xf32>
      %149 = arith.addf %146, %148 : vector<8x1xf32>
      %150 = vector.broadcast %142 : vector<8x1xf32> to vector<8x8xf32>
      %151 = arith.mulf %150, %arg21 : vector<8x8xf32>
      %152 = arith.truncf %145 : vector<8x8xf32> to vector<8x8xbf16>
      %cst_40 = arith.constant dense<0.000000e+00> : vector<8x8xf32>
      %153 = tpu.matmul %152, %134, %cst_40 {dimension_numbers = #tpu.dot_dimension_numbers<[1], [0], [0], [1], [0, 0, 1, 1], [], []>} : vector<8x8xbf16>, vector<8x8xbf16>, vector<8x8xf32> -> vector<8x8xf32>
      %154 = arith.addf %151, %153 : vector<8x8xf32>
      scf.yield %71, %80, %85, %94, %103, %108, %117, %126, %131, %140, %149, %154 : vector<8x1xf32>, vector<8x1xf32>, vector<8x8xf32>, vector<8x1xf32>, vector<8x1xf32>, vector<8x8xf32>, vector<8x1xf32>, vector<8x1xf32>, vector<8x8xf32>, vector<8x1xf32>, vector<8x1xf32>, vector<8x8xf32>
    }
    %24 = tpu.reciprocal %23#1 {approx = true} : vector<8x1xf32> -> vector<8x1xf32>
    %25 = vector.broadcast %24 : vector<8x1xf32> to vector<8x8xf32>
    %26 = arith.mulf %23#2, %25 : vector<8x8xf32>
    %27 = arith.truncf %26 : vector<8x8xf32> to vector<8x8xbf16>
    %28 = tpu.reciprocal %23#4 {approx = true} : vector<8x1xf32> -> vector<8x1xf32>
    %29 = vector.broadcast %28 : vector<8x1xf32> to vector<8x8xf32>
    %30 = arith.mulf %23#5, %29 : vector<8x8xf32>
    %31 = arith.truncf %30 : vector<8x8xf32> to vector<8x8xbf16>
    %32 = tpu.reciprocal %23#7 {approx = true} : vector<8x1xf32> -> vector<8x1xf32>
    %33 = vector.broadcast %32 : vector<8x1xf32> to vector<8x8xf32>
    %34 = arith.mulf %23#8, %33 : vector<8x8xf32>
    %35 = arith.truncf %34 : vector<8x8xf32> to vector<8x8xbf16>
    %36 = tpu.reciprocal %23#10 {approx = true} : vector<8x1xf32> -> vector<8x1xf32>
    %37 = vector.broadcast %36 : vector<8x1xf32> to vector<8x8xf32>
    %38 = arith.mulf %23#11, %37 : vector<8x8xf32>
    %39 = arith.truncf %38 : vector<8x8xf32> to vector<8x8xbf16>
    %40 = tpu.concatenate %27, %31, %35, %39 in 1 : vector<8x8xbf16>, vector<8x8xbf16>, vector<8x8xbf16>, vector<8x8xbf16> -> vector<8x32xbf16>
    %c0_16 = arith.constant 0 : index
    %c0_17 = arith.constant 0 : index
    %41 = vector.load %arg5[%c0_16, %c0_17] : memref<32x32xbf16, #tpu.memory_space<vmem>>, vector<32x32xbf16>
    %cst_18 = arith.constant dense<0.000000e+00> : vector<8x32xf32>
    %42 = tpu.matmul %40, %41, %cst_18 {dimension_numbers = #tpu.dot_dimension_numbers<[1], [0], [0], [1], [0, 0, 1, 1], [], []>} : vector<8x32xbf16>, vector<32x32xbf16>, vector<8x32xf32> -> vector<8x32xf32>
    %43 = arith.addf %5, %42 : vector<8x32xf32>
    %c0_19 = arith.constant 0 : index
    %c0_20 = arith.constant 0 : index
    %44 = vector.load %arg6[%c0_19, %c0_20] : memref<1x32xf32, #tpu.memory_space<vmem>>, vector<1x32xf32>
    %45 = vector.broadcast %44 : vector<1x32xf32> to vector<8x32xf32>
    %46 = arith.addf %43, %45 : vector<8x32xf32>
    %c0_21 = arith.constant 0 : index
    %c0_22 = arith.constant 0 : index
    %c0_23 = arith.constant 0 : index
    %47 = vector.load %arg7[%c0_21, %c0_22, %c0_23] : memref<1x8x32xf32, #tpu.memory_space<vmem>>, vector<1x8x32xf32>
    %48 = vector.shape_cast %47 : vector<1x8x32xf32> to vector<8x32xf32>
    %49 = vector.shape_cast %46 : vector<8x32xf32> to vector<1x8x32xf32>
    tpu.vector_store %arg7[%c0_21, %c0_22, %c0_23], %49 {strides = array<i32>} : memref<1x8x32xf32, #tpu.memory_space<vmem>>, vector<1x8x32xf32>,
    return
  }
  func.func @transform_0(%arg0: i32, %arg1: i32) -> (i32, i32, i32) {
    %c0_i32 = arith.constant 0 : i32
    %c0_i32_0 = arith.constant 0 : i32
    %c0_i32_1 = arith.constant 0 : i32
    return %arg0, %c0_i32, %c0_i32_0 : i32, i32, i32
  }
  func.func @transform_1(%arg0: i32, %arg1: i32) -> (i32, i32) {
    %c0_i32 = arith.constant 0 : i32
    %c0_i32_0 = arith.constant 0 : i32
    %c0_i32_1 = arith.constant 0 : i32
    return %c0_i32, %c0_i32_0 : i32, i32
  }
  func.func @transform_2(%arg0: i32, %arg1: i32) -> (i32, i32) {
    %c0_i32 = arith.constant 0 : i32
    %c0_i32_0 = arith.constant 0 : i32
    %c0_i32_1 = arith.constant 0 : i32
    return %c0_i32, %c0_i32_0 : i32, i32
  }
  func.func @transform_3(%arg0: i32, %arg1: i32) -> (i32, i32) {
    %c0_i32 = arith.constant 0 : i32
    %c0_i32_0 = arith.constant 0 : i32
    %c0_i32_1 = arith.constant 0 : i32
    return %c0_i32, %c0_i32_0 : i32, i32
  }
  func.func @transform_4(%arg0: i32, %arg1: i32) -> (i32, i32) {
    %c0_i32 = arith.constant 0 : i32
    %c0_i32_0 = arith.constant 0 : i32
    %c0_i32_1 = arith.constant 0 : i32
    return %c0_i32, %c0_i32_0 : i32, i32
  }
  func.func @transform_5(%arg0: i32, %arg1: i32) -> (i32, i32, i32) {
    %c0_i32 = arith.constant 0 : i32
    %c0_i32_0 = arith.constant 0 : i32
    return %arg0, %arg1, %c0_i32 : i32, i32, i32
  }
}

</mosaic_0001>

<bundles_post_ra>
// kernel: tpu_custom_call.1
= control target key start
LH: loop header
LB: loop body
LE: loop exit
PB: predicated region body
PF: predicated region fallthrough
CT: control target
= control target key end

     0   :  { %10 = vsyncpa [#allocation4], 0  ;;  %s1826_s0 = inlined_call_operand.hbm [shape: f32[2,8,32], index: 0, kind: input, shape index: {}]   ;;  %s1827_s1 = inlined_call_operand.hbm [shape: bf16[32,96], index: 1, kind: input, shape index: {}]   ;;  %s1828_s2 = inlined_call_operand.vmem [shape: f32[1,96], index: 2, kind: input, shape index: {}]   ;;  %s1829_s3 = inlined_call_operand.hbm [shape: bf16[32,32], index: 3, kind: input, shape index: {}]   ;;  %s1830_s4 = inlined_call_operand.vmem [shape: f32[1,32], index: 4, kind: input, shape index: {}]   ;;  %s1831_s5 = inlined_call_operand.hbm [shape: f32[2,8,32], index: 5, kind: output, shape index: {}]  }
   0x1   :  { %12 = vsyncpa [#allocation4 + $0x1], 0 }
   0x2   :  { %13 = vsyncpa [#allocation7], 0 }
   0x3   :  { %14 = vsyncpa [#allocation5], 0 }
   0x4   :  { %16 = vsyncpa [#allocation5 + $0x1], 0  ;;  %s1476_s18 = smov 0   ;;  %s1478_s19 = smov 0  }
   0x5   :  { %s1480_s20 = smov 0   ;;  %s1482_s21 = smov 0  }
   0x6   :  { %s1484_s22 = smov 0   ;;  %s1486_s23 = smov 0  }
   0x7 LB: > { %s868_s24 = sadd.s32 4294967295, %s1374_s23   ;;  %p870_p0 = scmp.ge.s32.totalorder %s1374_s23, 1  ;;  %s1374_s23 = sphi %s1486_s23, %s22_s23   ;;  %s1370_s22 = sphi %s1484_s22, %s1857_s22   ;;  %s1366_s21 = sphi %s1482_s21, %s1856_s21   ;;  %s1362_s20 = sphi %s1480_s20, %s1855_s20   ;;  %s1358_s19 = sphi %s1478_s19, %s1854_s19   ;;  %s1354_s18 = sphi %s1476_s18, %s1853_s18  }
   0x8   : > { %p1510_p1 = scmp.eq.s32.totalorder %s868_s24, 0  ;;  %p177_p2 = scmp.lt.s32.totalorder %s1374_s23, 3 }
   0x9   : > { %s188_s28 = sshll.u32 %s1827_s1, 4  ;;  %s1428_s30 = smov [#allocation6]   ;;  %s189_s28 = int_to_ptr.hbm [resolvable:$true] %s188_s28 }
   0xa   : > { %p1518_p3 = pnand %p870_p0, %p177_p2  ;;  %s190_s6 = sshll.u32 %s1428_s30, 4  ;;  %s191_s6 = int_to_ptr.vmem [resolvable:$true] %s190_s6 }
   0xb   : > { %p873_p6 = scmp.ge.s32.totalorder %s1374_s23, 2  ;;  %s205_s9 = sshll.u32 %s1829_s3, 4  ;;  %s206_s9 = int_to_ptr.hbm [resolvable:$true] %s205_s9 }
   0xc   : > { %p929_p4 = pneg %p1518_p3  ;;  %s1429_s10 = smov 64  }
   0xd   : > { %s1430_s11 = smov 4   ;;  %s1431_s12 = smov [#allocation8]  }
   0xe   : > { %p930_p5 = pnand %p929_p4, %p1510_p1  ;;  %s207_s13 = sshll.u32 %s1431_s12, 4  ;;  %s208_s13 = int_to_ptr.vmem [resolvable:$true] %s207_s13 }
   0xf   : > { %s34_s14 = sadd.s32 1, %s1370_s22  ;;  %s869_s15 = sadd.s32 4294967294, %s1374_s23  }
  0x10   : > { %932 = dma.hbm_to_vmem [thread:$0]  (!%p930_p5), %s189_s28, 256, %s191_s6, [#allocation7], %s1429_s10, %s1429_s10, %s1430_s11  }
  0x11   : > { %935 = dma.hbm_to_vmem [thread:$0]  (!%p930_p5), %s206_s9, 256, %s208_s13, [#allocation7], %s1429_s10, %s1429_s10, %s1430_s11  }
  0x12   : > { %p36_p7 = scmp.ge.s32.totalorder %s34_s14, 2  ;;  %s41_s16 = sadd.s32 1, %s1362_s20 }
  0x13   : > { %p48_p8 = scmp.ne.s32.totalorder %s1362_s20, %s1358_s19  ;;  %p49_p9 = scmp.eq.s32.totalorder %s1374_s23, 0 }
  0x14   : > { %s1859_s14 = smov (%p36_p7, %s34_s14), 0  ;;  %p54_p10 = scmp.ne.s32.totalorder %s1358_s19, %s1354_s18 }
  0x15   : > { %s38_s17 = ssub.s32 %s1370_s22, %s1859_s14  ;;  %p164_p11 = scmp.eq.s32.totalorder %s868_s24, 1 }
  0x16   : > { %p39_p12 = scmp.eq.s32.totalorder %s38_s17, 0  ;;  %p1546_p13 = por %p1510_p1, %p54_p10 }
  0x17   : > { %p1550_p0 = por %p164_p11, %p48_p8  ;;  %p170_p2 = scmp.eq.s32.totalorder %s869_s15, 1 }
  0x18   : > { %s1555_s28 = scalar_select %p39_p12, %s1362_s20, %s41_s16  }
  0x19   : > { %p50_p4 = por %p49_p9, %p48_p8  ;;  %p1557_p5 = por %p170_p2, %p54_p10 }
  0x1a   : > { %s224_s6 = sand.u32 1, %s1362_s20   ;;  %s875_s24 = sshll.u32 %s1370_s22, 3 }
  0x1b   : > { %p946_p7 = scmp.lt.s32.totalorder %s1374_s23, 2  ;;  %s874_s7 = sshll.u32 %s224_s6, 3 }
  0x1c   : > { %s232_s10 = scalar_lea.hbm %s1826_s0, %s875_s24  ;;  %s228_s12 = scalar_lea.vmem [#allocation3], %s874_s7 }
  0x1d   : > { %s234_s11 = sshll.u32 %s232_s10, 4  ;;  %s236_s13 = sshll.u32 %s228_s12, 4  ;;  %s235_s11 = int_to_ptr.hbm [resolvable:$true] %s234_s11  ;;  %s237_s13 = int_to_ptr.vmem [resolvable:$true] %s236_s13 }
  0x1e   : > { %p937_p11 = pnand %p946_p7, %p50_p4  ;;  %s225_s15 = scalar_lea.sflag [#allocation4], %s224_s6 }
  0x1f   : > { %245 = sbr.rel (%p1518_p3) target bundleno = 1258 (0x4ea), region = 40  ;;  %s1570_s16 = sand.u32 (!%p1518_p3), 1, %s1358_s19  }
  0x20   : > { %939 = dma.hbm_to_vmem [thread:$0]  (!%p937_p11), %s235_s11, 128, %s237_s13, %s225_s15  }
  0x21   : > { %s877_s17 = sshll.u32 (!%p1518_p3), %s1570_s16, 3  ;;  %s248_s8 = scalar_lea.sflag (!%p1518_p3), [#allocation4], %s1570_s16 }
  0x22   : > { %s251_s24 = scalar_lea.vmem (!%p1518_p3), [#allocation3], %s877_s17 }
  0x24   : > { %1341 = dma.done.wait (%p1546_p13), %s248_s8, 128  }
  0x25   : > { %1343 = vsyncadd (%p1546_p13), %s248_s8, 4294967168 }
  0x26   : > { %1345 = dma.done.wait (%p1510_p1), [#allocation7], 512  }
  0x27   : > { %1347 = vsyncadd (%p1510_p1), [#allocation7], 4294966784  ;;  %v914_v0 = vld [vmem:[#allocation6 + $0x8] sm:$0xff]  ;;  %v913_v1 = vld [vmem:[#allocation6] sm:$0xff]  ;;  %vm316_vm0 = vcmask 261120   ;;  %vm334_vm1 = vcmask 781312  }
  0x28   : > { %326 = vmatpush.bf16.msra.mxu0 %v914_v0  ;;  %v294_v2 = vld [vmem:[%s251_s24] sm:$0xff]  ;;  %v1120_v4 = vld [vmem:[%s1828_s2] ss:$0 sm:$0xff]  ;;  %s1588_s25 = scalar_lea.vmem [#allocation9], %s877_s17  ;;  %v1590_v10 = vmov 0.0   ;;  %v1592_v11 = vmov 0.0  }
  0x29   : > { %v295_v3 = vpack.c.bf16 %v294_v2, %v294_v2  ;;  %v1594_v12 = vmov -inf   ;;  %v1596_v13 = vmov 0.0   ;;  %v1598_v14 = vmov 0.0   ;;  %s1614_s26 = smov 0  }
  0x2a   : > { %v1600_v15 = vmov -inf   ;;  %v1602_v16 = vmov 0.0   ;;  %v1604_v17 = vmov 0.0   ;;  %v1606_v18 = vmov -inf  }
  0x2b   : > { %v1608_v19 = vmov 0.0   ;;  %v1610_v20 = vmov 0.0   ;;  %v1612_v21 = vmov -inf  }
  0x2c   : > { %327 = vmatpush.bf16.msra.mxu0 %v913_v1 }
  0x2f   : > { %889 = vmatmul.msk.bf16.vlgmr.msra.gmra.mxu0 %vm316_vm0, %v295_v3 }
  0xac   : > { %v329_v5 = vpop.f32.mrf.mxu0 }
  0xad   : > { %v330_v6 = vadd.f32 %v1120_v4, %v329_v5 }
  0xaf   : > { %v333_v7 = vpack.c.bf16 %v330_v6, %v330_v6 }
  0xb1   : > { %335 = vst.msk [vmem:[#allocation2] sm:$0xf] %vm334_vm1, %v333_v7 }
  0xb4   : > { %v331_v8 = vpop.f32.mrf.mxu0 }
  0xb8   : > { %v1586_v9 = vld [vmem:[#allocation2] sm:$0xf] }
  0xb9 LB: >> { %s890_s7 = sshll.u32 %s1426_s26, 3  ;;  %s1432_s12 = smov 96   ;;  %v443_v25 = vunpack.c.l.b16 %v1586_v9  ;;  %vm381_vm2 = vcmask 64512   ;;  %v367_v35 = vlaneseq  ;;  %vm424_vm4 = vcmask 1043456   ;;  %s1426_s26 = sphi %s1614_s26, %s346_s26   ;;  %v1422_v21 = vphi %v1612_v21, %v1852_v21   ;;  %v1418_v20 = vphi %v1610_v20, %v1851_v20   ;;  %v1414_v19 = vphi %v1608_v19, %v1850_v19   ;;  %v1410_v18 = vphi %v1606_v18, %v1849_v18   ;;  %v1406_v17 = vphi %v1604_v17, %v1848_v17   ;;  %v1402_v16 = vphi %v1602_v16, %v1847_v16   ;;  %v1398_v15 = vphi %v1600_v15, %v1846_v15   ;;  %v1394_v14 = vphi %v1598_v14, %v1845_v14   ;;  %v1390_v13 = vphi %v1596_v13, %v1844_v13   ;;  %v1386_v12 = vphi %v1594_v12, %v1843_v12   ;;  %v1382_v11 = vphi %v1592_v11, %v1842_v11   ;;  %v1378_v10 = vphi %v1590_v10, %v1841_v10  }
  0xba   : >> { %s362_s9 = sshra.s32 %s890_s7, 3  ;;  %s1433_s13 = smov 88   ;;  %v373_v37 = vstv %s890_s7 }
  0xbb   : >> { %s891_s10 = sshll.u32 %s362_s9, 2  ;;  %v444_v26 = vpack.c.b16 %v443_v25, %v443_v25  ;;  %s1434_s15 = smov 120   ;;  %v372_v36 = vand.u32 127, %v367_v35  ;;  %v1668_v38 = vshrl.u32 %v367_v35, 7 }
  0xbc   : >> { %s365_s11 = scalar_lea.vmem [#allocation2], %s891_s10  ;;  %s1435_s17 = smov 72  }
  0xbd   : >> { %v366_v22 = vld [vmem:[%s365_s11] sm:$0xf]  ;;  %s1436_s8 = smov 104   ;;  %s1437_s24 = smov 64   ;;  %v1670_v39 = vadd.s32 %v373_v37, %v372_v36 }
  0xbe   : >> { %v377_v23 = vunpack.c.l.b16 %v366_v22  ;;  %s1438_s29 = smov 80   ;;  %s1439_s6 = smov 112  }
  0xbf   : >> { %vm375_vm3 = vcmp.le.s32.totalorder %v1670_v39, %v1668_v38  ;;  %s1440_s9 = smov 56   ;;  %s1441_s7 = smov 40  }
  0xc0   : >> { %v378_v24 = vpack.c.b16 %v377_v23, %v377_v23  ;;  %s1442_s10 = smov 48   ;;  %s346_s26 = sadd.s32 1, %s1426_s26  }
  0xc1   : >> { %p1739_p1 = scmp.ge.s32.totalorder %s346_s26, 1 }
  0xc2   : >> { %379 = vrot.lane.b32.xlu0 %v378_v24, %s1432_s12  ;;  %447 = vrot.lane.b32.xlu1 %v378_v24, %s1433_s13  ;;  %s1443_s12 = smov (%p1739_p1), 8   ;;  %s1444_s26 = smov (%p1739_p1), 24   ;;  %vm665_vm5 = vcmask (%p1739_p1), 130048   ;;  %vm668_vm6 = vcmask (%p1739_p1), 195584  }
  0xc3   : >> { %419 = vrot.lane.b32.xlu2 %v378_v24, %s1437_s24  ;;  %s1445_s13 = smov (%p1739_p1), 16  }
  0xca   : >> { %445 = vrot.lane.b32.xlu1 %v444_v26, %s1434_s15  ;;  %s910_s15 = sshll.u32 (%p1739_p1), %s1366_s21, 3 }
  0xcb   : >> { %510 = vrot.lane.b32.xlu2 %v378_v24, %s1438_s29  ;;  %s720_s24 = scalar_lea.hbm (%p1739_p1), %s1831_s5, %s910_s15 }
  0xd2   : >> { %573 = vrot.lane.b32.xlu1 %v378_v24, %s1435_s17 }
  0xd3   : >> { %508 = vrot.lane.b32.xlu2 %v444_v26, %s1439_s6 }
  0xda   : >> { %571 = vrot.lane.b32.xlu1 %v444_v26, %s1436_s8 }
  0xe2   : >> { %486 = vrot.lane.b32.xlu1 %v378_v24, %s1440_s9  ;;  %s722_s9 = sshll.u32 (%p1739_p1), %s1588_s25, 4  ;;  %s723_s9 = int_to_ptr.vmem [resolvable:$true] %s722_s9 }
 0x11d   : >> { %v420_v52 = vpop.permute.xlu2 %419 }
 0x11e   : >> { %v426_v53 = vsel %vm424_vm4, %v420_v52, 0 }
 0x11f   : >> { %435 = vmatpush.bf16.msra.mxu1 %v426_v53 }
 0x125   : >> { %v511_v54 = vpop.permute.xlu2 %510 }
 0x126   : >> { %v516_v55 = vsel %vm381_vm2, %v511_v54, 0 }
 0x127   : >> { %525 = vmatpush.bf16.xpose.msrb.mxu1 %v516_v55 }
 0x12d   : >> { %v509_v56 = vpop.permute.xlu2 %508 }
 0x134   : >> { %v380_v27 = vpop.permute.xlu0 %379  ;;  %v448_v28 = vpop.permute.xlu1 %447 }
 0x135   : >> { %v386_v29 = vsel %vm381_vm2, %v380_v27, 0  ;;  %v453_v30 = vsel %vm381_vm2, %v448_v28, 0 }
 0x136   : >> { %395 = vmatpush.bf16.xpose.msra.mxu0 %v386_v29  ;;  %462 = vmatpush.bf16.xpose.msra.mxu2 %v453_v30 }
 0x13c   : >> { %v446_v31 = vpop.permute.xlu1 %445 }
 0x13d   : >> { %892 = vmatmul.msk.bf16.vlgmr.msra.gmra.mxu0 %vm381_vm2, %v1586_v9  ;;  %894 = vmatmul.msk.bf16.vlgmr.msra.gmra.mxu2 %vm381_vm2, %v446_v31 }
 0x144   : >> { %v574_v32 = vpop.permute.xlu1 %573 }
 0x145   : >> { %v579_v33 = vsel %vm381_vm2, %v574_v32, 0 }
 0x146   : >> { %588 = vmatpush.bf16.xpose.msrb.mxu0 %v579_v33 }
 0x14c   : >> { %v572_v34 = vpop.permute.xlu1 %571 }
 0x14d   : >> { %898 = vmatmul.msk.bf16.vlgmr.msrb.gmra.mxu0 %vm381_vm2, %v572_v34 }
 0x154   : >> { %v487_v61 = vpop.permute.xlu1 %486 }
 0x155   : >> { %v492_v62 = vsel %vm424_vm4, %v487_v61, 0 }
 0x156   : >> { %501 = vmatpush.bf16.msra.mxu3 %v492_v62 }
 0x1ba   : >> { %v397_v40 = vpop.f32.mrf.mxu0 }
 0x1bb   : >> { %v401_v41 = vsel %vm375_vm3, %v397_v40, -10000.0 }
 0x1bc   : >> { %v402_v42 = vsel %vm381_vm2, %v401_v41, -inf }
 0x1bd   : >> { %403 = vmax.xlane.f32.xlu0 %v402_v42 }
 0x1c0   : >> { %v464_v43 = vpop.f32.mrf.mxu2 }
 0x1c1   : >> { %v468_v45 = vsel %vm375_vm3, %v464_v43, -10000.0 }
 0x1c2   : >> { %v399_v44 = vpop.f32.mrf.mxu0  ;;  %v469_v46 = vsel %vm381_vm2, %v468_v45, -inf }
 0x1c3   : >> { %470 = vmax.xlane.f32.xlu2 %v469_v46 }
 0x1c8   : >> { %v466_v47 = vpop.f32.mrf.mxu2 }
 0x1ca   : >> { %v590_v48 = vpop.f32.mrf.mxu0 }
 0x1cb   : >> { %v594_v49 = vsel %vm375_vm3, %v590_v48, -10000.0 }
 0x1cc   : >> { %v595_v50 = vsel %vm381_vm2, %v594_v49, -inf }
 0x1cd   : >> { %596 = vmax.xlane.f32.xlu0 %v595_v50 }
 0x1d2   : >> { %v592_v51 = vpop.f32.mrf.mxu0 }
 0x1db   : >> { %612 = vrot.lane.b32.xlu2 %v378_v24, %s1441_s7  ;;  %s724_s7 = sshll.u32 (%p1739_p1), %s720_s24, 4  ;;  %s725_s7 = int_to_ptr.hbm [resolvable:$true] %s724_s7 }
 0x1dc   : > { %s1250_s11 = sshra.s32 (%p1739_p1), %s725_s7, 4  ;;  %s1251_s11 = int_to_ptr.hbm [resolvable:$true] %s1250_s11 }
 0x1dd   : > { %s1252_s21 = scalar_lea.hbm (%p1739_p1), %s1251_s11, 8  ;;  %p1257_p10 = scmp.lt.s32.totalorder (%p1739_p1), %s1251_s11, %s1831_s5 }
 0x1de   : > { %p1253_p3 = scmp.ne.s32.totalorder (%p1739_p1), %s1251_s11, %s1252_s21 }
 0x1e0   : > { %p1254_p8 = pnand (%p1739_p1), %p1253_p3, %p1550_p0 }
 0x1e1   : >> { %549 = vrot.lane.b32.xlu0 %v378_v24, %s1442_s10  ;;  %s709_s10 = scalar_lea.sflag (%p1739_p1), [#allocation5], %s1570_s16 }
 0x1e2   : > { %p1255_p9 = pneg (%p1739_p1), %p1254_p8 }
 0x230   : >> { %v404_v57 = vpop.xlane.xlu0 %403 }
 0x231   : >> { %v1689_v58 = vmax.f32 %v1422_v21, %v404_v57  }
 0x233   : >> { %v406_v59 = vsub.f32 %v1422_v21, %v1689_v58  ;;  %v409_v60 = vsub.f32 %v401_v41, %v1689_v58 }
 0x235   : >> { %v410_v63 = vmul.f32 1.442695, %v409_v60  ;;  %v407_v30 = vmul.f32 1.442695, %v406_v59 }
 0x236   : >> { %v471_v0 = vpop.xlane.xlu2 %470 }
 0x237   : >> { %1121 = vpow2.f32 %v410_v63  ;;  %v1696_v1 = vmax.f32 %v1410_v18, %v471_v0  }
 0x239   : >> { %v473_v2 = vsub.f32 %v1410_v18, %v1696_v1  ;;  %v476_v3 = vsub.f32 %v468_v45, %v1696_v1 }
 0x23b   : >> { %v477_v4 = vmul.f32 1.442695, %v476_v3  ;;  %v474_v35 = vmul.f32 1.442695, %v473_v2 }
 0x23d   : >> { %v1122_v5 = vpop.eup %1121  ;;  %1123 = vpow2.f32 %v477_v4 }
 0x23e   : >> { %v413_v6 = vsel %vm381_vm2, %v1122_v5, 0.0  ;;  %v418_v7 = vpack.c.bf16 %v1122_v5, %v1122_v5  ;;  %v613_v27 = vpop.permute.xlu2 %612 }
 0x23f   : >> { %414 = vadd.xlane.f32.xlu0 %v413_v6  ;;  %v618_v28 = vsel %vm424_vm4, %v613_v27, 0 }
 0x240   : >> { %v597_v8 = vpop.xlane.xlu0 %596  ;;  %893 = vmatmul.msk.bf16.vlgmr.msra.gmra.mxu1 %vm381_vm2, %v418_v7  ;;  %627 = vmatpush.bf16.msrb.mxu2 %v618_v28 }
 0x241   : >> { %v1704_v21 = vmax.f32 %v1386_v12, %v597_v8  }
 0x243   : >> { %v599_v22 = vsub.f32 %v1386_v12, %v1704_v21  ;;  %v1124_v23 = vpop.eup %1123  ;;  %v602_v24 = vsub.f32 %v594_v49, %v1704_v21 }
 0x244   : >> { %v485_v18 = vpack.c.bf16 %v1124_v23, %v1124_v23  ;;  %v480_v50 = vsel %vm381_vm2, %v1124_v23, 0.0 }
 0x245   : >> { %v603_v25 = vmul.f32 1.442695, %v602_v24 }
 0x246   : >> { %895 = vmatmul.msk.bf16.vlgmr.msra.gmra.mxu3 %vm381_vm2, %v485_v18 }
 0x247   : >> { %1125 = vpow2.f32 %v603_v25 }
 0x248   : >> { %1127 = vpow2.f32 %v407_v30 }
 0x249   : >> { %1129 = vpow2.f32 %v474_v35 }
 0x24d   : >> { %v1126_v26 = vpop.eup %1125 }
 0x24e   : >> { %v611_v29 = vpack.c.bf16 %v1126_v26, %v1126_v26  ;;  %v1128_v31 = vpop.eup %1127 }
 0x24f   : >> { %v412_v32 = vmul.f32 %v1418_v20, %v1128_v31  ;;  %v417_v36 = vmul.f32 %v1414_v19, %v1128_v31  ;;  %v1130_v41 = vpop.eup %1129 }
 0x250   : >> { %896 = vmatmul.msk.bf16.vlgmr.msrb.gmra.mxu1 %vm381_vm2, %v509_v56  ;;  %899 = vmatmul.msk.bf16.vlgmr.msrb.gmra.mxu2 %vm381_vm2, %v611_v29  ;;  %v484_v43 = vmul.f32 %v1402_v16, %v1130_v41  ;;  %v479_v61 = vmul.f32 %v1406_v17, %v1130_v41 }
 0x253   : >> { %v550_v12 = vpop.permute.xlu0 %549 }
 0x254   : >> { %v555_v51 = vsel %vm424_vm4, %v550_v12, 0  ;;  %v1843_v12 = vmov %v1704_v21  ;;  %v1852_v21 = vmov %v1689_v58 }
 0x255   : >> { %564 = vmatpush.bf16.msrb.mxu3 %v555_v51 }
 0x2b2   : >> { %v415_v33 = vpop.xlane.xlu0 %414 }
 0x2b3   : >> { %v1714_v20 = vadd.f32 %v415_v33, %v412_v32  }
 0x2b5   : >> { %v1837_v34 = vmov %v1714_v20 }
 0x2bd   : >> { %v437_v37 = vpop.f32.mrf.mxu1 }
 0x2be   : >> { %v1717_v19 = vadd.f32 %v437_v37, %v417_v36  }
 0x2c0   : >> { %v1838_v40 = vmov %v1717_v19  ;;  %v606_v19 = vsel %vm381_vm2, %v1126_v26, 0.0 }
 0x2c5   : >> { %v439_v42 = vpop.f32.mrf.mxu1 }
 0x2c9   : >> { %v503_v44 = vpop.f32.mrf.mxu3 }
 0x2ca   : >> { %v1720_v16 = vadd.f32 %v503_v44, %v484_v43  }
 0x2cc   : >> { %v1839_v45 = vmov %v1720_v16  ;;  %v600_v16 = vmul.f32 1.442695, %v599_v22 }
 0x2cd   : >> { %v527_v46 = vpop.f32.mrf.mxu1 }
 0x2ce   : >> { %v531_v47 = vsel %vm375_vm3, %v527_v46, -10000.0  ;;  %1131 = vpow2.f32 %v600_v16  ;;  %v1847_v16 = vmov %v1839_v45 }
 0x2cf   : >> { %v532_v20 = vsel %vm381_vm2, %v531_v47, -inf }
 0x2d0   : >> { %533 = vmax.xlane.f32.xlu1 %v532_v20  ;;  %v1851_v20 = vmov %v1837_v34 }
 0x2d1   : >> { %v505_v48 = vpop.f32.mrf.mxu3 }
 0x2d3   : >> { %v629_v39 = vpop.f32.mrf.mxu2 }
 0x2d4   : >> { %v1132_v52 = vpop.eup %1131 }
 0x2d5   : >> { %v529_v49 = vpop.f32.mrf.mxu1  ;;  %v610_v38 = vmul.f32 %v1378_v10, %v1132_v52  ;;  %v605_v10 = vmul.f32 %v1382_v11, %v1132_v52 }
 0x2d7   : >> { %v633_v53 = vadd.f32 %v629_v39, %v610_v38  }
 0x2d8   : >> { %481 = vadd.xlane.f32.xlu1 %v480_v50 }
 0x2db   : >> { %v631_v54 = vpop.f32.mrf.mxu2 }
 0x2e0   : >> { %607 = vadd.xlane.f32.xlu1 %v606_v19  ;;  %v1850_v19 = vmov %v1838_v40 }
 0x343   : >> { %v534_v55 = vpop.xlane.xlu1 %533 }
 0x344   : >> { %v535_v56 = vmax.f32 %v1398_v15, %v534_v55  }
 0x346   : >> { %v536_v57 = vsub.f32 %v1398_v15, %v535_v56  ;;  %v539_v59 = vsub.f32 %v531_v47, %v535_v56 }
 0x348   : >> { %v540_v60 = vmul.f32 1.442695, %v539_v59  ;;  %v537_v6 = vmul.f32 1.442695, %v536_v57 }
 0x34a   : >> { %1133 = vpow2.f32 %v540_v60 }
 0x34b   : >> { %v482_v62 = vpop.xlane.xlu1 %481  ;;  %1135 = vpow2.f32 %v537_v6 }
 0x34c   : >> { %v483_v63 = vadd.f32 %v482_v62, %v479_v61  }
 0x34e   : > { %1138 = vrcp.f32 (%p1739_p1), %v483_v63 }
 0x350   : >> { %v1134_v0 = vpop.eup %1133 }
 0x351   : >> { %v543_v2 = vsel %vm381_vm2, %v1134_v0, 0.0  ;;  %v548_v3 = vpack.c.bf16 %v1134_v0, %v1134_v0  ;;  %v1136_v15 = vpop.eup %1135 }
 0x352   : >> { %544 = vadd.xlane.f32.xlu2 %v543_v2  ;;  %v542_v7 = vmul.f32 %v1394_v14, %v1136_v15  ;;  %v547_v22 = vmul.f32 %v1390_v13, %v1136_v15  ;;  %v1846_v15 = vmov %v535_v56 }
 0x353   : >> { %v608_v4 = vpop.xlane.xlu1 %607  ;;  %897 = vmatmul.msk.bf16.vlgmr.msrb.gmra.mxu3 %vm381_vm2, %v548_v3 }
 0x354   : >> { %v609_v5 = vadd.f32 %v608_v4, %v605_v10   ;;  %v1841_v10 = vmov %v633_v53  ;;  %v1139_v21 = vpop.eup (%p1739_p1), %1138 }
 0x356   : >> { %v1842_v11 = vmov %v609_v5 }
 0x357   : > { %v916_v11 = vld [vmem:[#allocation8 + $0x8] sm:$0xff] (%p1739_p1) }
 0x358   : > { %700 = vmatpush.bf16.msra.mxu0 (%p1739_p1), %v916_v11 }
 0x3c5   : >> { %v545_v17 = vpop.xlane.xlu2 %544 }
 0x3c6   : >> { %v546_v8 = vadd.f32 %v545_v17, %v542_v7   ;;  %v1848_v17 = vmov %v483_v63 }
 0x3c8   : >> { %v1845_v14 = vmov %v546_v8  ;;  %1140 = vrcp.f32 (%p1739_p1), %v546_v8 }
 0x3c9   : > { %1142 = vrcp.f32 (%p1739_p1), %v609_v5 }
 0x3ca   : > { %1144 = vrcp.f32 (%p1739_p1), %v1837_v34  ;;  %v1137_v34 = vld [vmem:[%s1830_s4] ss:$0 sm:$0xff] (%p1739_p1) }
 0x3ce   : > { %v1141_v25 = vpop.eup (%p1739_p1), %1140 }
 0x3cf   : > { %v1143_v26 = vpop.eup (%p1739_p1), %1142 }
 0x3d0   : > { %v644_v29 = vmul.f32 (%p1739_p1), %v1143_v26, %v633_v53  ;;  %v1145_v14 = vpop.eup (%p1739_p1), %1144 }
 0x3d1   : > { %v635_v37 = vmul.f32 (%p1739_p1), %v1145_v14, %v1838_v40 }
 0x3d2   : > { %v645_v32 = vpack.c.bf16 (%p1739_p1), %v644_v29, %v644_v29 }
 0x3d3   : > { %v636_v41 = vpack.c.bf16 (%p1739_p1), %v635_v37, %v635_v37 }
 0x3d4   : > { %v657_v58 = vunpack.c.l.b16 (%p1739_p1), %v645_v32 }
 0x3d6   : >> { %v566_v23 = vpop.f32.mrf.mxu3  ;;  %v658_v36 = vpack.c.b16 (%p1739_p1), %v657_v58, %v657_v58 }
 0x3d7   : >> { %v570_v24 = vadd.f32 %v566_v23, %v547_v22  }
 0x3d8   : > { %659 = vrot.lane.b32.xlu1 (%p1739_p1), %v658_v36, %s1444_s26 }
 0x3d9   : >> { %v1844_v13 = vmov %v570_v24  ;;  %v641_v27 = vmul.f32 (%p1739_p1), %v1141_v25, %v570_v24 }
 0x3da   : > { %v915_v13 = vld [vmem:[#allocation8] sm:$0xff] (%p1739_p1) }
 0x3db   : > { %348 = sbr.rel (!%p1739_p1) target bundleno = 185 (0xb9), region = 106  ;;  %v642_v31 = vpack.c.bf16 (%p1739_p1), %v641_v27, %v641_v27  ;;  %701 = vmatpush.bf16.msra.mxu0 (%p1739_p1), %v915_v13 }
 0x3dd   : > { %v652_v35 = vunpack.c.l.b16 (%p1739_p1), %v642_v31 }
 0x3de   : >> { %v568_v18 = vpop.f32.mrf.mxu3 }
 0x3df   : >> { %v1849_v18 = vmov %v1696_v1  ;;  %v638_v1 = vmul.f32 (%p1739_p1), %v1139_v21, %v1839_v45  ;;  %v653_v9 = vpack.c.b16 (%p1739_p1), %v652_v35, %v652_v35 }
 0x3e1   : > { %v639_v28 = vpack.c.bf16 %v638_v1, %v638_v1 }
 0x3e3   : > { %v647_v30 = vunpack.c.l.b16 %v639_v28 }
 0x3e5   : > { %v648_v33 = vpack.c.b16 %v647_v30, %v647_v30 }
 0x3e7   : > { %649 = vrot.lane.b32.xlu0 %v648_v33, %s1443_s12 }
 0x3ef   : > { %654 = vrot.lane.b32.xlu0 %v653_v9, %s1445_s13  ;;  %s1256_s13 = scalar_lea.hbm %s1831_s5, 16 }
 0x3f0   : > { %p1258_p12 = scmp.lt.s32.totalorder %s1256_s13, %s1252_s21 }
 0x3f2   : > { %p1259_p13 = por %p1258_p12, %p1257_p10 }
 0x3f4   : > { %p1260_p2 = pnand %p1259_p13, %p1255_p9 }
 0x44a   : > { %v660_v42 = vpop.permute.xlu1 %659 }
 0x459   : > { %v650_v12 = vpop.permute.xlu0 %649 }
 0x45a   : > { %v664_v43 = vsel %vm381_vm2, %v636_v41, %v650_v12 }
 0x461   : > { %v655_v44 = vpop.permute.xlu0 %654 }
 0x462   : > { %v667_v45 = vsel %vm665_vm5, %v664_v43, %v655_v44 }
 0x463   : > { %v670_v46 = vsel %vm668_vm6, %v667_v45, %v660_v42 }
 0x464   : > { %908 = vmatmul.msk.bf16.vlgmr.msra.gmra.mxu0 %vm316_vm0, %v670_v46 }
 0x4e1   : > { %v703_v40 = vpop.f32.mrf.mxu0 }
 0x4e2   : > { %v704_v47 = vadd.f32 %v1137_v34, %v703_v40 }
 0x4e4   : > { %707 = vst.msk [vmem:[%s1588_s25] sm:$0xff] %vm316_vm0, %v704_v47 }
 0x4e5   : > { %1263 = shalt.err (!%p1260_p2)
}
 0x4e6   : > { %927 = dma.vmem_to_hbm [thread:$0]  (%p1550_p0), %s723_s9, 128, %s725_s7, %s709_s10  }
 0x4e9   : > { %v705_v20 = vpop.f32.mrf.mxu0 }
 0x4ea PF: > { %s736_s16 = sand.u32 1, %s1354_s18   ;;  %p941_p4 = pnand %p873_p6, %p1557_p5 }
 0x4eb   : > { %s737_s25 = scalar_lea.sflag [#allocation5], %s736_s16 }
 0x4ec   : > { %p942_p7 = pneg %p941_p4 }
 0x4ee   : > { %1349 = dma.done.wait (%p942_p7), %s737_s25, 128  }
 0x4ef   : > { %1351 = vsyncadd (%p942_p7), %s737_s25, 4294967168  ;;  %s22_s23 = sadd.s32 1, %s1374_s23   ;;  %s1853_s18 = smov %s1358_s19 }
 0x4f0   : > { %p19_p11 = scmp.ge.s32.totalorder %s22_s23, 4   ;;  %s1854_s19 = smov %s1362_s20 }
 0x4f1   : > { %s1855_s20 = smov %s1555_s28  ;;  %s1856_s21 = smov %s1370_s22 }
 0x4f2   : > { %s1857_s22 = smov %s1859_s14  ;;  %21 = sbr.rel (!%p19_p11) target bundleno = 7 (0x7), region = 117 }
 0x4f7   :  { %743 = vsyncpa [#allocation4], 1 }
 0x4f8   :  { %745 = vsyncpa [#allocation4 + $0x1], 1 }
 0x4f9   :  { %746 = vsyncpa [#allocation7], 1 }
 0x4fa   :  { %747 = vsyncpa [#allocation5], 1 }
 0x4fb   :  { %749 = vsyncpa [#allocation5 + $0x1], 1 }

// kernel: tpu_custom_call.1
= control target key start
LH: loop header
LB: loop body
LE: loop exit
PB: predicated region body
PF: predicated region fallthrough
CT: control target
= control target key end

     0   :  { %10 = vsyncpa [#allocation4], 0  ;;  %s1826_s0 = inlined_call_operand.hbm [shape: f32[2,8,32], index: 0, kind: input, shape index: {}]   ;;  %s1827_s1 = inlined_call_operand.hbm [shape: bf16[32,96], index: 1, kind: input, shape index: {}]   ;;  %s1828_s2 = inlined_call_operand.vmem [shape: f32[1,96], index: 2, kind: input, shape index: {}]   ;;  %s1829_s3 = inlined_call_operand.hbm [shape: bf16[32,32], index: 3, kind: input, shape index: {}]   ;;  %s1830_s4 = inlined_call_operand.vmem [shape: f32[1,32], index: 4, kind: input, shape index: {}]   ;;  %s1831_s5 = inlined_call_operand.hbm [shape: f32[2,8,32], index: 5, kind: output, shape index: {}]  }
   0x1   :  { %12 = vsyncpa [#allocation4 + $0x1], 0 }
   0x2   :  { %13 = vsyncpa [#allocation7], 0 }
   0x3   :  { %14 = vsyncpa [#allocation5], 0 }
   0x4   :  { %16 = vsyncpa [#allocation5 + $0x1], 0  ;;  %s1476_s18 = smov 0   ;;  %s1478_s19 = smov 0  }
   0x5   :  { %s1480_s20 = smov 0   ;;  %s1482_s21 = smov 0  }
   0x6   :  { %s1484_s22 = smov 0   ;;  %s1486_s23 = smov 0  }
   0x7 LB: > { %s868_s24 = sadd.s32 4294967295, %s1374_s23   ;;  %p870_p0 = scmp.ge.s32.totalorder %s1374_s23, 1  ;;  %s1374_s23 = sphi %s1486_s23, %s22_s23   ;;  %s1370_s22 = sphi %s1484_s22, %s1857_s22   ;;  %s1366_s21 = sphi %s1482_s21, %s1856_s21   ;;  %s1362_s20 = sphi %s1480_s20, %s1855_s20   ;;  %s1358_s19 = sphi %s1478_s19, %s1854_s19   ;;  %s1354_s18 = sphi %s1476_s18, %s1853_s18  }
   0x8   : > { %p1510_p1 = scmp.eq.s32.totalorder %s868_s24, 0  ;;  %p177_p2 = scmp.lt.s32.totalorder %s1374_s23, 3 }
   0x9   : > { %s188_s28 = sshll.u32 %s1827_s1, 4  ;;  %s1428_s30 = smov [#allocation6]   ;;  %s189_s28 = int_to_ptr.hbm [resolvable:$true] %s188_s28 }
   0xa   : > { %p1518_p3 = pnand %p870_p0, %p177_p2  ;;  %s190_s6 = sshll.u32 %s1428_s30, 4  ;;  %s191_s6 = int_to_ptr.vmem [resolvable:$true] %s190_s6 }
   0xb   : > { %p873_p6 = scmp.ge.s32.totalorder %s1374_s23, 2  ;;  %s205_s9 = sshll.u32 %s1829_s3, 4  ;;  %s206_s9 = int_to_ptr.hbm [resolvable:$true] %s205_s9 }
   0xc   : > { %p929_p4 = pneg %p1518_p3  ;;  %s1429_s10 = smov 64  }
   0xd   : > { %s1430_s11 = smov 4   ;;  %s1431_s12 = smov [#allocation8]  }
   0xe   : > { %p930_p5 = pnand %p929_p4, %p1510_p1  ;;  %s207_s13 = sshll.u32 %s1431_s12, 4  ;;  %s208_s13 = int_to_ptr.vmem [resolvable:$true] %s207_s13 }
   0xf   : > { %s34_s14 = sadd.s32 1, %s1370_s22  ;;  %s869_s15 = sadd.s32 4294967294, %s1374_s23  }
  0x10   : > { %932 = dma.hbm_to_vmem [thread:$0]  (!%p930_p5), %s189_s28, 256, %s191_s6, [#allocation7], %s1429_s10, %s1429_s10, %s1430_s11  }
  0x11   : > { %935 = dma.hbm_to_vmem [thread:$0]  (!%p930_p5), %s206_s9, 256, %s208_s13, [#allocation7], %s1429_s10, %s1429_s10, %s1430_s11  }
  0x12   : > { %p36_p7 = scmp.ge.s32.totalorder %s34_s14, 2  ;;  %s41_s16 = sadd.s32 1, %s1362_s20 }
  0x13   : > { %p48_p8 = scmp.ne.s32.totalorder %s1362_s20, %s1358_s19  ;;  %p49_p9 = scmp.eq.s32.totalorder %s1374_s23, 0 }
  0x14   : > { %s1859_s14 = smov (%p36_p7, %s34_s14), 0  ;;  %p54_p10 = scmp.ne.s32.totalorder %s1358_s19, %s1354_s18 }
  0x15   : > { %s38_s17 = ssub.s32 %s1370_s22, %s1859_s14  ;;  %p164_p11 = scmp.eq.s32.totalorder %s868_s24, 1 }
  0x16   : > { %p39_p12 = scmp.eq.s32.totalorder %s38_s17, 0  ;;  %p1546_p13 = por %p1510_p1, %p54_p10 }
  0x17   : > { %p1550_p0 = por %p164_p11, %p48_p8  ;;  %p170_p2 = scmp.eq.s32.totalorder %s869_s15, 1 }
  0x18   : > { %s1555_s28 = scalar_select %p39_p12, %s1362_s20, %s41_s16  }
  0x19   : > { %p50_p4 = por %p49_p9, %p48_p8  ;;  %p1557_p5 = por %p170_p2, %p54_p10 }
  0x1a   : > { %s224_s6 = sand.u32 1, %s1362_s20   ;;  %s875_s24 = sshll.u32 %s1370_s22, 3 }
  0x1b   : > { %p946_p7 = scmp.lt.s32.totalorder %s1374_s23, 2  ;;  %s874_s7 = sshll.u32 %s224_s6, 3 }
  0x1c   : > { %s232_s10 = scalar_lea.hbm %s1826_s0, %s875_s24  ;;  %s228_s12 = scalar_lea.vmem [#allocation3], %s874_s7 }
  0x1d   : > { %s234_s11 = sshll.u32 %s232_s10, 4  ;;  %s236_s13 = sshll.u32 %s228_s12, 4  ;;  %s235_s11 = int_to_ptr.hbm [resolvable:$true] %s234_s11  ;;  %s237_s13 = int_to_ptr.vmem [resolvable:$true] %s236_s13 }
  0x1e   : > { %p937_p11 = pnand %p946_p7, %p50_p4  ;;  %s225_s15 = scalar_lea.sflag [#allocation4], %s224_s6 }
  0x1f   : > { %245 = sbr.rel (%p1518_p3) target bundleno = 1258 (0x4ea), region = 40  ;;  %s1570_s16 = sand.u32 (!%p1518_p3), 1, %s1358_s19  }
  0x20   : > { %939 = dma.hbm_to_vmem [thread:$0]  (!%p937_p11), %s235_s11, 128, %s237_s13, %s225_s15  }
  0x21   : > { %s877_s17 = sshll.u32 (!%p1518_p3), %s1570_s16, 3  ;;  %s248_s8 = scalar_lea.sflag (!%p1518_p3), [#allocation4], %s1570_s16 }
  0x22   : > { %s251_s24 = scalar_lea.vmem (!%p1518_p3), [#allocation3], %s877_s17 }
  0x24   : > { %1341 = dma.done.wait (%p1546_p13), %s248_s8, 128  }
  0x25   : > { %1343 = vsyncadd (%p1546_p13), %s248_s8, 4294967168 }
  0x26   : > { %1345 = dma.done.wait (%p1510_p1), [#allocation7], 512  }
  0x27   : > { %1347 = vsyncadd (%p1510_p1), [#allocation7], 4294966784  ;;  %v914_v0 = vld [vmem:[#allocation6 + $0x8] sm:$0xff]  ;;  %v913_v1 = vld [vmem:[#allocation6] sm:$0xff]  ;;  %vm316_vm0 = vcmask 261120   ;;  %vm334_vm1 = vcmask 781312  }
  0x28   : > { %326 = vmatpush.bf16.msra.mxu0 %v914_v0  ;;  %v294_v2 = vld [vmem:[%s251_s24] sm:$0xff]  ;;  %v1120_v4 = vld [vmem:[%s1828_s2] ss:$0 sm:$0xff]  ;;  %s1588_s25 = scalar_lea.vmem [#allocation9], %s877_s17  ;;  %v1590_v10 = vmov 0.0   ;;  %v1592_v11 = vmov 0.0  }
  0x29   : > { %v295_v3 = vpack.c.bf16 %v294_v2, %v294_v2  ;;  %v1594_v12 = vmov -inf   ;;  %v1596_v13 = vmov 0.0   ;;  %v1598_v14 = vmov 0.0   ;;  %s1614_s26 = smov 0  }
  0x2a   : > { %v1600_v15 = vmov -inf   ;;  %v1602_v16 = vmov 0.0   ;;  %v1604_v17 = vmov 0.0   ;;  %v1606_v18 = vmov -inf  }
  0x2b   : > { %v1608_v19 = vmov 0.0   ;;  %v1610_v20 = vmov 0.0   ;;  %v1612_v21 = vmov -inf  }
  0x2c   : > { %327 = vmatpush.bf16.msra.mxu0 %v913_v1 }
  0x2f   : > { %889 = vmatmul.msk.bf16.vlgmr.msra.gmra.mxu0 %vm316_vm0, %v295_v3 }
  0xac   : > { %v329_v5 = vpop.f32.mrf.mxu0 }
  0xad   : > { %v330_v6 = vadd.f32 %v1120_v4, %v329_v5 }
  0xaf   : > { %v333_v7 = vpack.c.bf16 %v330_v6, %v330_v6 }
  0xb1   : > { %335 = vst.msk [vmem:[#allocation2] sm:$0xf] %vm334_vm1, %v333_v7 }
  0xb4   : > { %v331_v8 = vpop.f32.mrf.mxu0 }
  0xb8   : > { %v1586_v9 = vld [vmem:[#allocation2] sm:$0xf] }
  0xb9 LB: >> { %s890_s7 = sshll.u32 %s1426_s26, 3  ;;  %s1432_s12 = smov 96   ;;  %v443_v25 = vunpack.c.l.b16 %v1586_v9  ;;  %vm381_vm2 = vcmask 64512   ;;  %v367_v35 = vlaneseq  ;;  %vm424_vm4 = vcmask 1043456   ;;  %s1426_s26 = sphi %s1614_s26, %s346_s26   ;;  %v1422_v21 = vphi %v1612_v21, %v1852_v21   ;;  %v1418_v20 = vphi %v1610_v20, %v1851_v20   ;;  %v1414_v19 = vphi %v1608_v19, %v1850_v19   ;;  %v1410_v18 = vphi %v1606_v18, %v1849_v18   ;;  %v1406_v17 = vphi %v1604_v17, %v1848_v17   ;;  %v1402_v16 = vphi %v1602_v16, %v1847_v16   ;;  %v1398_v15 = vphi %v1600_v15, %v1846_v15   ;;  %v1394_v14 = vphi %v1598_v14, %v1845_v14   ;;  %v1390_v13 = vphi %v1596_v13, %v1844_v13   ;;  %v1386_v12 = vphi %v1594_v12, %v1843_v12   ;;  %v1382_v11 = vphi %v1592_v11, %v1842_v11   ;;  %v1378_v10 = vphi %v1590_v10, %v1841_v10  }
  0xba   : >> { %s362_s9 = sshra.s32 %s890_s7, 3  ;;  %s1433_s13 = smov 88   ;;  %v373_v37 = vstv %s890_s7 }
  0xbb   : >> { %s891_s10 = sshll.u32 %s362_s9, 2  ;;  %v444_v26 = vpack.c.b16 %v443_v25, %v443_v25  ;;  %s1434_s15 = smov 120   ;;  %v372_v36 = vand.u32 127, %v367_v35  ;;  %v1668_v38 = vshrl.u32 %v367_v35, 7 }
  0xbc   : >> { %s365_s11 = scalar_lea.vmem [#allocation2], %s891_s10  ;;  %s1435_s17 = smov 72  }
  0xbd   : >> { %v366_v22 = vld [vmem:[%s365_s11] sm:$0xf]  ;;  %s1436_s8 = smov 104   ;;  %s1437_s24 = smov 64   ;;  %v1670_v39 = vadd.s32 %v373_v37, %v372_v36 }
  0xbe   : >> { %v377_v23 = vunpack.c.l.b16 %v366_v22  ;;  %s1438_s29 = smov 80   ;;  %s1439_s6 = smov 112  }
  0xbf   : >> { %vm375_vm3 = vcmp.le.s32.totalorder %v1670_v39, %v1668_v38  ;;  %s1440_s9 = smov 56   ;;  %s1441_s7 = smov 40  }
  0xc0   : >> { %v378_v24 = vpack.c.b16 %v377_v23, %v377_v23  ;;  %s1442_s10 = smov 48   ;;  %s346_s26 = sadd.s32 1, %s1426_s26  }
  0xc1   : >> { %p1739_p1 = scmp.ge.s32.totalorder %s346_s26, 1 }
  0xc2   : >> { %379 = vrot.lane.b32.xlu0 %v378_v24, %s1432_s12  ;;  %447 = vrot.lane.b32.xlu1 %v378_v24, %s1433_s13  ;;  %s1443_s12 = smov (%p1739_p1), 8   ;;  %s1444_s26 = smov (%p1739_p1), 24   ;;  %vm665_vm5 = vcmask (%p1739_p1), 130048   ;;  %vm668_vm6 = vcmask (%p1739_p1), 195584  }
  0xc3   : >> { %419 = vrot.lane.b32.xlu2 %v378_v24, %s1437_s24  ;;  %s1445_s13 = smov (%p1739_p1), 16  }
  0xca   : >> { %445 = vrot.lane.b32.xlu1 %v444_v26, %s1434_s15  ;;  %s910_s15 = sshll.u32 (%p1739_p1), %s1366_s21, 3 }
  0xcb   : >> { %510 = vrot.lane.b32.xlu2 %v378_v24, %s1438_s29  ;;  %s720_s24 = scalar_lea.hbm (%p1739_p1), %s1831_s5, %s910_s15 }
  0xd2   : >> { %573 = vrot.lane.b32.xlu1 %v378_v24, %s1435_s17 }
  0xd3   : >> { %508 = vrot.lane.b32.xlu2 %v444_v26, %s1439_s6 }
  0xda   : >> { %571 = vrot.lane.b32.xlu1 %v444_v26, %s1436_s8 }
  0xe2   : >> { %486 = vrot.lane.b32.xlu1 %v378_v24, %s1440_s9  ;;  %s722_s9 = sshll.u32 (%p1739_p1), %s1588_s25, 4  ;;  %s723_s9 = int_to_ptr.vmem [resolvable:$true] %s722_s9 }
 0x11d   : >> { %v420_v52 = vpop.permute.xlu2 %419 }
 0x11e   : >> { %v426_v53 = vsel %vm424_vm4, %v420_v52, 0 }
 0x11f   : >> { %435 = vmatpush.bf16.msra.mxu1 %v426_v53 }
 0x125   : >> { %v511_v54 = vpop.permute.xlu2 %510 }
 0x126   : >> { %v516_v55 = vsel %vm381_vm2, %v511_v54, 0 }
 0x127   : >> { %525 = vmatpush.bf16.xpose.msrb.mxu1 %v516_v55 }
 0x12d   : >> { %v509_v56 = vpop.permute.xlu2 %508 }
 0x134   : >> { %v380_v27 = vpop.permute.xlu0 %379  ;;  %v448_v28 = vpop.permute.xlu1 %447 }
 0x135   : >> { %v386_v29 = vsel %vm381_vm2, %v380_v27, 0  ;;  %v453_v30 = vsel %vm381_vm2, %v448_v28, 0 }
 0x136   : >> { %395 = vmatpush.bf16.xpose.msra.mxu0 %v386_v29  ;;  %462 = vmatpush.bf16.xpose.msra.mxu2 %v453_v30 }
 0x13c   : >> { %v446_v31 = vpop.permute.xlu1 %445 }
 0x13d   : >> { %892 = vmatmul.msk.bf16.vlgmr.msra.gmra.mxu0 %vm381_vm2, %v1586_v9  ;;  %894 = vmatmul.msk.bf16.vlgmr.msra.gmra.mxu2 %vm381_vm2, %v446_v31 }
 0x144   : >> { %v574_v32 = vpop.permute.xlu1 %573 }
 0x145   : >> { %v579_v33 = vsel %vm381_vm2, %v574_v32, 0 }
 0x146   : >> { %588 = vmatpush.bf16.xpose.msrb.mxu0 %v579_v33 }
 0x14c   : >> { %v572_v34 = vpop.permute.xlu1 %571 }
 0x14d   : >> { %898 = vmatmul.msk.bf16.vlgmr.msrb.gmra.mxu0 %vm381_vm2, %v572_v34 }
 0x154   : >> { %v487_v61 = vpop.permute.xlu1 %486 }
 0x155   : >> { %v492_v62 = vsel %vm424_vm4, %v487_v61, 0 }
 0x156   : >> { %501 = vmatpush.bf16.msra.mxu3 %v492_v62 }
 0x1ba   : >> { %v397_v40 = vpop.f32.mrf.mxu0 }
 0x1bb   : >> { %v401_v41 = vsel %vm375_vm3, %v397_v40, -10000.0 }
 0x1bc   : >> { %v402_v42 = vsel %vm381_vm2, %v401_v41, -inf }
 0x1bd   : >> { %403 = vmax.xlane.f32.xlu0 %v402_v42 }
 0x1c0   : >> { %v464_v43 = vpop.f32.mrf.mxu2 }
 0x1c1   : >> { %v468_v45 = vsel %vm375_vm3, %v464_v43, -10000.0 }
 0x1c2   : >> { %v399_v44 = vpop.f32.mrf.mxu0  ;;  %v469_v46 = vsel %vm381_vm2, %v468_v45, -inf }
 0x1c3   : >> { %470 = vmax.xlane.f32.xlu2 %v469_v46 }
 0x1c8   : >> { %v466_v47 = vpop.f32.mrf.mxu2 }
 0x1ca   : >> { %v590_v48 = vpop.f32.mrf.mxu0 }
 0x1cb   : >> { %v594_v49 = vsel %vm375_vm3, %v590_v48, -10000.0 }
 0x1cc   : >> { %v595_v50 = vsel %vm381_vm2, %v594_v49, -inf }
 0x1cd   : >> { %596 = vmax.xlane.f32.xlu0 %v595_v50 }
 0x1d2   : >> { %v592_v51 = vpop.f32.mrf.mxu0 }
 0x1db   : >> { %612 = vrot.lane.b32.xlu2 %v378_v24, %s1441_s7  ;;  %s724_s7 = sshll.u32 (%p1739_p1), %s720_s24, 4  ;;  %s725_s7 = int_to_ptr.hbm [resolvable:$true] %s724_s7 }
 0x1dc   : > { %s1250_s11 = sshra.s32 (%p1739_p1), %s725_s7, 4  ;;  %s1251_s11 = int_to_ptr.hbm [resolvable:$true] %s1250_s11 }
 0x1dd   : > { %s1252_s21 = scalar_lea.hbm (%p1739_p1), %s1251_s11, 8  ;;  %p1257_p10 = scmp.lt.s32.totalorder (%p1739_p1), %s1251_s11, %s1831_s5 }
 0x1de   : > { %p1253_p3 = scmp.ne.s32.totalorder (%p1739_p1), %s1251_s11, %s1252_s21 }
 0x1e0   : > { %p1254_p8 = pnand (%p1739_p1), %p1253_p3, %p1550_p0 }
 0x1e1   : >> { %549 = vrot.lane.b32.xlu0 %v378_v24, %s1442_s10  ;;  %s709_s10 = scalar_lea.sflag (%p1739_p1), [#allocation5], %s1570_s16 }
 0x1e2   : > { %p1255_p9 = pneg (%p1739_p1), %p1254_p8 }
 0x230   : >> { %v404_v57 = vpop.xlane.xlu0 %403 }
 0x231   : >> { %v1689_v58 = vmax.f32 %v1422_v21, %v404_v57  }
 0x233   : >> { %v406_v59 = vsub.f32 %v1422_v21, %v1689_v58  ;;  %v409_v60 = vsub.f32 %v401_v41, %v1689_v58 }
 0x235   : >> { %v410_v63 = vmul.f32 1.442695, %v409_v60  ;;  %v407_v30 = vmul.f32 1.442695, %v406_v59 }
 0x236   : >> { %v471_v0 = vpop.xlane.xlu2 %470 }
 0x237   : >> { %1121 = vpow2.f32 %v410_v63  ;;  %v1696_v1 = vmax.f32 %v1410_v18, %v471_v0  }
 0x239   : >> { %v473_v2 = vsub.f32 %v1410_v18, %v1696_v1  ;;  %v476_v3 = vsub.f32 %v468_v45, %v1696_v1 }
 0x23b   : >> { %v477_v4 = vmul.f32 1.442695, %v476_v3  ;;  %v474_v35 = vmul.f32 1.442695, %v473_v2 }
 0x23d   : >> { %v1122_v5 = vpop.eup %1121  ;;  %1123 = vpow2.f32 %v477_v4 }
 0x23e   : >> { %v413_v6 = vsel %vm381_vm2, %v1122_v5, 0.0  ;;  %v418_v7 = vpack.c.bf16 %v1122_v5, %v1122_v5  ;;  %v613_v27 = vpop.permute.xlu2 %612 }
 0x23f   : >> { %414 = vadd.xlane.f32.xlu0 %v413_v6  ;;  %v618_v28 = vsel %vm424_vm4, %v613_v27, 0 }
 0x240   : >> { %v597_v8 = vpop.xlane.xlu0 %596  ;;  %893 = vmatmul.msk.bf16.vlgmr.msra.gmra.mxu1 %vm381_vm2, %v418_v7  ;;  %627 = vmatpush.bf16.msrb.mxu2 %v618_v28 }
 0x241   : >> { %v1704_v21 = vmax.f32 %v1386_v12, %v597_v8  }
 0x243   : >> { %v599_v22 = vsub.f32 %v1386_v12, %v1704_v21  ;;  %v1124_v23 = vpop.eup %1123  ;;  %v602_v24 = vsub.f32 %v594_v49, %v1704_v21 }
 0x244   : >> { %v485_v18 = vpack.c.bf16 %v1124_v23, %v1124_v23  ;;  %v480_v50 = vsel %vm381_vm2, %v1124_v23, 0.0 }
 0x245   : >> { %v603_v25 = vmul.f32 1.442695, %v602_v24 }
 0x246   : >> { %895 = vmatmul.msk.bf16.vlgmr.msra.gmra.mxu3 %vm381_vm2, %v485_v18 }
 0x247   : >> { %1125 = vpow2.f32 %v603_v25 }
 0x248   : >> { %1127 = vpow2.f32 %v407_v30 }
 0x249   : >> { %1129 = vpow2.f32 %v474_v35 }
 0x24d   : >> { %v1126_v26 = vpop.eup %1125 }
 0x24e   : >> { %v611_v29 = vpack.c.bf16 %v1126_v26, %v1126_v26  ;;  %v1128_v31 = vpop.eup %1127 }
 0x24f   : >> { %v412_v32 = vmul.f32 %v1418_v20, %v1128_v31  ;;  %v417_v36 = vmul.f32 %v1414_v19, %v1128_v31  ;;  %v1130_v41 = vpop.eup %1129 }
 0x250   : >> { %896 = vmatmul.msk.bf16.vlgmr.msrb.gmra.mxu1 %vm381_vm2, %v509_v56  ;;  %899 = vmatmul.msk.bf16.vlgmr.msrb.gmra.mxu2 %vm381_vm2, %v611_v29  ;;  %v484_v43 = vmul.f32 %v1402_v16, %v1130_v41  ;;  %v479_v61 = vmul.f32 %v1406_v17, %v1130_v41 }
 0x253   : >> { %v550_v12 = vpop.permute.xlu0 %549 }
 0x254   : >> { %v555_v51 = vsel %vm424_vm4, %v550_v12, 0  ;;  %v1843_v12 = vmov %v1704_v21  ;;  %v1852_v21 = vmov %v1689_v58 }
 0x255   : >> { %564 = vmatpush.bf16.msrb.mxu3 %v555_v51 }
 0x2b2   : >> { %v415_v33 = vpop.xlane.xlu0 %414 }
 0x2b3   : >> { %v1714_v20 = vadd.f32 %v415_v33, %v412_v32  }
 0x2b5   : >> { %v1837_v34 = vmov %v1714_v20 }
 0x2bd   : >> { %v437_v37 = vpop.f32.mrf.mxu1 }
 0x2be   : >> { %v1717_v19 = vadd.f32 %v437_v37, %v417_v36  }
 0x2c0   : >> { %v1838_v40 = vmov %v1717_v19  ;;  %v606_v19 = vsel %vm381_vm2, %v1126_v26, 0.0 }
 0x2c5   : >> { %v439_v42 = vpop.f32.mrf.mxu1 }
 0x2c9   : >> { %v503_v44 = vpop.f32.mrf.mxu3 }
 0x2ca   : >> { %v1720_v16 = vadd.f32 %v503_v44, %v484_v43  }
 0x2cc   : >> { %v1839_v45 = vmov %v1720_v16  ;;  %v600_v16 = vmul.f32 1.442695, %v599_v22 }
 0x2cd   : >> { %v527_v46 = vpop.f32.mrf.mxu1 }
 0x2ce   : >> { %v531_v47 = vsel %vm375_vm3, %v527_v46, -10000.0  ;;  %1131 = vpow2.f32 %v600_v16  ;;  %v1847_v16 = vmov %v1839_v45 }
 0x2cf   : >> { %v532_v20 = vsel %vm381_vm2, %v531_v47, -inf }
 0x2d0   : >> { %533 = vmax.xlane.f32.xlu1 %v532_v20  ;;  %v1851_v20 = vmov %v1837_v34 }
 0x2d1   : >> { %v505_v48 = vpop.f32.mrf.mxu3 }
 0x2d3   : >> { %v629_v39 = vpop.f32.mrf.mxu2 }
 0x2d4   : >> { %v1132_v52 = vpop.eup %1131 }
 0x2d5   : >> { %v529_v49 = vpop.f32.mrf.mxu1  ;;  %v610_v38 = vmul.f32 %v1378_v10, %v1132_v52  ;;  %v605_v10 = vmul.f32 %v1382_v11, %v1132_v52 }
 0x2d7   : >> { %v633_v53 = vadd.f32 %v629_v39, %v610_v38  }
 0x2d8   : >> { %481 = vadd.xlane.f32.xlu1 %v480_v50 }
 0x2db   : >> { %v631_v54 = vpop.f32.mrf.mxu2 }
 0x2e0   : >> { %607 = vadd.xlane.f32.xlu1 %v606_v19  ;;  %v1850_v19 = vmov %v1838_v40 }
 0x343   : >> { %v534_v55 = vpop.xlane.xlu1 %533 }
 0x344   : >> { %v535_v56 = vmax.f32 %v1398_v15, %v534_v55  }
 0x346   : >> { %v536_v57 = vsub.f32 %v1398_v15, %v535_v56  ;;  %v539_v59 = vsub.f32 %v531_v47, %v535_v56 }
 0x348   : >> { %v540_v60 = vmul.f32 1.442695, %v539_v59  ;;  %v537_v6 = vmul.f32 1.442695, %v536_v57 }
 0x34a   : >> { %1133 = vpow2.f32 %v540_v60 }
 0x34b   : >> { %v482_v62 = vpop.xlane.xlu1 %481  ;;  %1135 = vpow2.f32 %v537_v6 }
 0x34c   : >> { %v483_v63 = vadd.f32 %v482_v62, %v479_v61  }
 0x34e   : > { %1138 = vrcp.f32 (%p1739_p1), %v483_v63 }
 0x350   : >> { %v1134_v0 = vpop.eup %1133 }
 0x351   : >> { %v543_v2 = vsel %vm381_vm2, %v1134_v0, 0.0  ;;  %v548_v3 = vpack.c.bf16 %v1134_v0, %v1134_v0  ;;  %v1136_v15 = vpop.eup %1135 }
 0x352   : >> { %544 = vadd.xlane.f32.xlu2 %v543_v2  ;;  %v542_v7 = vmul.f32 %v1394_v14, %v1136_v15  ;;  %v547_v22 = vmul.f32 %v1390_v13, %v1136_v15  ;;  %v1846_v15 = vmov %v535_v56 }
 0x353   : >> { %v608_v4 = vpop.xlane.xlu1 %607  ;;  %897 = vmatmul.msk.bf16.vlgmr.msrb.gmra.mxu3 %vm381_vm2, %v548_v3 }
 0x354   : >> { %v609_v5 = vadd.f32 %v608_v4, %v605_v10   ;;  %v1841_v10 = vmov %v633_v53  ;;  %v1139_v21 = vpop.eup (%p1739_p1), %1138 }
 0x356   : >> { %v1842_v11 = vmov %v609_v5 }
 0x357   : > { %v916_v11 = vld [vmem:[#allocation8 + $0x8] sm:$0xff] (%p1739_p1) }
 0x358   : > { %700 = vmatpush.bf16.msra.mxu0 (%p1739_p1), %v916_v11 }
 0x3c5   : >> { %v545_v17 = vpop.xlane.xlu2 %544 }
 0x3c6   : >> { %v546_v8 = vadd.f32 %v545_v17, %v542_v7   ;;  %v1848_v17 = vmov %v483_v63 }
 0x3c8   : >> { %v1845_v14 = vmov %v546_v8  ;;  %1140 = vrcp.f32 (%p1739_p1), %v546_v8 }
 0x3c9   : > { %1142 = vrcp.f32 (%p1739_p1), %v609_v5 }
 0x3ca   : > { %1144 = vrcp.f32 (%p1739_p1), %v1837_v34  ;;  %v1137_v34 = vld [vmem:[%s1830_s4] ss:$0 sm:$0xff] (%p1739_p1) }
 0x3ce   : > { %v1141_v25 = vpop.eup (%p1739_p1), %1140 }
 0x3cf   : > { %v1143_v26 = vpop.eup (%p1739_p1), %1142 }
 0x3d0   : > { %v644_v29 = vmul.f32 (%p1739_p1), %v1143_v26, %v633_v53  ;;  %v1145_v14 = vpop.eup (%p1739_p1), %1144 }
 0x3d1   : > { %v635_v37 = vmul.f32 (%p1739_p1), %v1145_v14, %v1838_v40 }
 0x3d2   : > { %v645_v32 = vpack.c.bf16 (%p1739_p1), %v644_v29, %v644_v29 }
 0x3d3   : > { %v636_v41 = vpack.c.bf16 (%p1739_p1), %v635_v37, %v635_v37 }
 0x3d4   : > { %v657_v58 = vunpack.c.l.b16 (%p1739_p1), %v645_v32 }
 0x3d6   : >> { %v566_v23 = vpop.f32.mrf.mxu3  ;;  %v658_v36 = vpack.c.b16 (%p1739_p1), %v657_v58, %v657_v58 }
 0x3d7   : >> { %v570_v24 = vadd.f32 %v566_v23, %v547_v22  }
 0x3d8   : > { %659 = vrot.lane.b32.xlu1 (%p1739_p1), %v658_v36, %s1444_s26 }
 0x3d9   : >> { %v1844_v13 = vmov %v570_v24  ;;  %v641_v27 = vmul.f32 (%p1739_p1), %v1141_v25, %v570_v24 }
 0x3da   : > { %v915_v13 = vld [vmem:[#allocation8] sm:$0xff] (%p1739_p1) }
 0x3db   : > { %348 = sbr.rel (!%p1739_p1) target bundleno = 185 (0xb9), region = 106  ;;  %v642_v31 = vpack.c.bf16 (%p1739_p1), %v641_v27, %v641_v27  ;;  %701 = vmatpush.bf16.msra.mxu0 (%p1739_p1), %v915_v13 }
 0x3dd   : > { %v652_v35 = vunpack.c.l.b16 (%p1739_p1), %v642_v31 }
 0x3de   : >> { %v568_v18 = vpop.f32.mrf.mxu3 }
 0x3df   : >> { %v1849_v18 = vmov %v1696_v1  ;;  %v638_v1 = vmul.f32 (%p1739_p1), %v1139_v21, %v1839_v45  ;;  %v653_v9 = vpack.c.b16 (%p1739_p1), %v652_v35, %v652_v35 }
 0x3e1   : > { %v639_v28 = vpack.c.bf16 %v638_v1, %v638_v1 }
 0x3e3   : > { %v647_v30 = vunpack.c.l.b16 %v639_v28 }
 0x3e5   : > { %v648_v33 = vpack.c.b16 %v647_v30, %v647_v30 }
 0x3e7   : > { %649 = vrot.lane.b32.xlu0 %v648_v33, %s1443_s12 }
 0x3ef   : > { %654 = vrot.lane.b32.xlu0 %v653_v9, %s1445_s13  ;;  %s1256_s13 = scalar_lea.hbm %s1831_s5, 16 }
 0x3f0   : > { %p1258_p12 = scmp.lt.s32.totalorder %s1256_s13, %s1252_s21 }
 0x3f2   : > { %p1259_p13 = por %p1258_p12, %p1257_p10 }
 0x3f4   : > { %p1260_p2 = pnand %p1259_p13, %p1255_p9 }
 0x44a   : > { %v660_v42 = vpop.permute.xlu1 %659 }
 0x459   : > { %v650_v12 = vpop.permute.xlu0 %649 }
 0x45a   : > { %v664_v43 = vsel %vm381_vm2, %v636_v41, %v650_v12 }
 0x461   : > { %v655_v44 = vpop.permute.xlu0 %654 }
 0x462   : > { %v667_v45 = vsel %vm665_vm5, %v664_v43, %v655_v44 }
 0x463   : > { %v670_v46 = vsel %vm668_vm6, %v667_v45, %v660_v42 }
 0x464   : > { %908 = vmatmul.msk.bf16.vlgmr.msra.gmra.mxu0 %vm316_vm0, %v670_v46 }
 0x4e1   : > { %v703_v40 = vpop.f32.mrf.mxu0 }
 0x4e2   : > { %v704_v47 = vadd.f32 %v1137_v34, %v703_v40 }
 0x4e4   : > { %707 = vst.msk [vmem:[%s1588_s25] sm:$0xff] %vm316_vm0, %v704_v47 }
 0x4e5   : > { %1263 = shalt.err (!%p1260_p2)
}
 0x4e6   : > { %927 = dma.vmem_to_hbm [thread:$0]  (%p1550_p0), %s723_s9, 128, %s725_s7, %s709_s10  }
 0x4e9   : > { %v705_v20 = vpop.f32.mrf.mxu0 }
 0x4ea PF: > { %s736_s16 = sand.u32 1, %s1354_s18   ;;  %p941_p4 = pnand %p873_p6, %p1557_p5 }
 0x4eb   : > { %s737_s25 = scalar_lea.sflag [#allocation5], %s736_s16 }
 0x4ec   : > { %p942_p7 = pneg %p941_p4 }
 0x4ee   : > { %1349 = dma.done.wait (%p942_p7), %s737_s25, 128  }
 0x4ef   : > { %1351 = vsyncadd (%p942_p7), %s737_s25, 4294967168  ;;  %s22_s23 = sadd.s32 1, %s1374_s23   ;;  %s1853_s18 = smov %s1358_s19 }
 0x4f0   : > { %p19_p11 = scmp.ge.s32.totalorder %s22_s23, 4   ;;  %s1854_s19 = smov %s1362_s20 }
 0x4f1   : > { %s1855_s20 = smov %s1555_s28  ;;  %s1856_s21 = smov %s1370_s22 }
 0x4f2   : > { %s1857_s22 = smov %s1859_s14  ;;  %21 = sbr.rel (!%p19_p11) target bundleno = 7 (0x7), region = 117 }
 0x4f7   :  { %743 = vsyncpa [#allocation4], 1 }
 0x4f8   :  { %745 = vsyncpa [#allocation4 + $0x1], 1 }
 0x4f9   :  { %746 = vsyncpa [#allocation7], 1 }
 0x4fa   :  { %747 = vsyncpa [#allocation5], 1 }
 0x4fb   :  { %749 = vsyncpa [#allocation5 + $0x1], 1 }

</bundles_post_ra>
